<compile_context>
chip_gen: v6e
topology: v6e:2x2x1
jax: 0.10.0
libtpu: 0.0.40
codegen_flags: <defaults>
</compile_context>

<pallas_src>
import functools
import math

import jax
import jax.numpy as jnp
from jax import lax
from jax.experimental import pallas as pl
from jax.experimental.pallas import tpu as pltpu


LN_EPS = 1e-12      # matches the reference CustomLayerNorm convention (nn.LayerNorm default: 1e-5)
NEG_INF = -1e9


def _vmem_capacity_bytes():
    try:
        info = pltpu.get_tpu_info()
        cap = getattr(info, "vmem_capacity_bytes", None)
        if cap:
            return int(cap)
    except Exception:
        pass
    return 64 * 1024 * 1024


_VMEM_CAP = _vmem_capacity_bytes()
VMEM_LIMIT = int(_VMEM_CAP * 0.75)    # scoped VMEM limit passed to Mosaic
VMEM_BUDGET = int(_VMEM_CAP * 0.60)   # budget used when deciding on fused paths / tile sizes


def _nbytes(shape, dtype):
    return math.prod(shape) * jnp.dtype(dtype).itemsize


def _pick_tile(n, candidates=(512, 256, 128)):
    """Largest MXU/lane-friendly tile that divides n, else the full extent."""
    for c in candidates:
        if n % c == 0:
            return c
    return n


# ----------------------------------------------------------------------------
# Pallas kernels
# ----------------------------------------------------------------------------

def _linear_kernel(x_ref, w_ref, b_ref, o_ref, acc_ref, *, activation, valid_n):
    """Tiled y = x @ w + b (optional ReLU). Grid (M//tm, N//tn, K//tk). bf16 in, f32 acc."""
    @pl.when(pl.program_id(2) == 0)
    def _():
        acc_ref[...] = jnp.zeros_like(acc_ref)

    acc_ref[...] += jnp.dot(x_ref[...], w_ref[...],
                            preferred_element_type=jnp.float32)

    @pl.when(pl.program_id(2) == pl.num_programs(2) - 1)
    def _():
        y = acc_ref[...] + b_ref[...]
        if activation == "relu":
            y = jnp.maximum(y, 0.0)
        if valid_n is not None:
            y = y[:, :valid_n]          # masked store of only the valid columns
        o_ref[...] = y.astype(o_ref.dtype)


def linear(x2d, w, b, activation=None, out_dtype=jnp.bfloat16, valid_n=None):
    m, kdim = x2d.shape
    n = w.shape[1]
    tm, tn, tk = _pick_tile(m), _pick_tile(n), _pick_tile(kdim)
    use_trunc = valid_n is not None and tn == n   # single N tile -> store valid cols directly
    out_n = valid_n if use_trunc else n
    out_bn = valid_n if use_trunc else tn
    kern = functools.partial(_linear_kernel, activation=activation,
                             valid_n=valid_n if use_trunc else None)
    out = pl.pallas_call(
        kern,
        out_shape=jax.ShapeDtypeStruct((m, out_n), out_dtype),
        grid=(m // tm, n // tn, kdim // tk),
        in_specs=[
            pl.BlockSpec((tm, tk), lambda i, j, kk: (i, kk)),
            pl.BlockSpec((tk, tn), lambda i, j, kk: (kk, j)),
            pl.BlockSpec((1, tn), lambda i, j, kk: (0, j)),
        ],
        out_specs=pl.BlockSpec((tm, out_bn), lambda i, j, kk: (i, j)),
        scratch_shapes=[pltpu.VMEM((tm, tn), jnp.float32)],
        compiler_params=pltpu.CompilerParams(
            dimension_semantics=("parallel", "parallel", "arbitrary"),
            vmem_limit_bytes=VMEM_LIMIT),
    )(x2d, w, b.reshape(1, n))
    if valid_n is not None and not use_trunc:
        out = out[:, :valid_n]
    return out


def _add_ln_kernel(x_ref, res_ref, g_ref, b_ref, o_ref, *, eps):
    """LayerNorm(x + residual) over the last dim (f32 math)."""
    y = x_ref[...].astype(jnp.float32) + res_ref[...].astype(jnp.float32)
    mean = jnp.mean(y, axis=-1, keepdims=True)
    var = jnp.mean((y - mean) ** 2, axis=-1, keepdims=True)
    o_ref[...] = ((y - mean) * lax.rsqrt(var + eps) * g_ref[...]
                  + b_ref[...]).astype(o_ref.dtype)


def add_layernorm(x2d, res2d, gamma, beta, eps=LN_EPS):
    m, d = x2d.shape
    tm = _pick_tile(m)
    kern = functools.partial(_add_ln_kernel, eps=eps)
    return pl.pallas_call(
        kern,
        out_shape=jax.ShapeDtypeStruct((m, d), jnp.bfloat16),
        grid=(m // tm,),
        in_specs=[
            pl.BlockSpec((tm, d), lambda i: (i, 0)),
            pl.BlockSpec((tm, d), lambda i: (i, 0)),
            pl.BlockSpec((1, d), lambda i: (0, 0)),
            pl.BlockSpec((1, d), lambda i: (0, 0)),
        ],
        out_specs=pl.BlockSpec((tm, d), lambda i: (i, 0)),
        compiler_params=pltpu.CompilerParams(
            dimension_semantics=("parallel",),
            vmem_limit_bytes=VMEM_LIMIT),
    )(x2d, res2d, gamma.reshape(1, d), beta.reshape(1, d))


def _linear_addln_kernel(x_ref, w_ref, b_ref, res_ref, g_ref, bln_ref,
                         o_ref, acc_ref, *, eps):
    """Tiled (x @ w + b + res) with LayerNorm fused in the finalize step.
    Grid (M//tm, K//tk); N (= feature dim) is not tiled so LN sees full rows."""
    @pl.when(pl.program_id(1) == 0)
    def _():
        acc_ref[...] = jnp.zeros_like(acc_ref)

    acc_ref[...] += jnp.dot(x_ref[...], w_ref[...],
                            preferred_element_type=jnp.float32)

    @pl.when(pl.program_id(1) == pl.num_programs(1) - 1)
    def _():
        y = acc_ref[...] + b_ref[...] + res_ref[...].astype(jnp.float32)
        mean = jnp.mean(y, axis=-1, keepdims=True)
        var = jnp.mean((y - mean) ** 2, axis=-1, keepdims=True)
        o_ref[...] = ((y - mean) * lax.rsqrt(var + eps) * g_ref[...]
                      + bln_ref[...]).astype(o_ref.dtype)


def linear_add_ln(x2d, w, b, res2d, gamma, beta, eps=LN_EPS):
    m, kdim = x2d.shape
    n = w.shape[1]
    tk = _pick_tile(kdim)
    tm = None
    for cand in ([c for c in (512, 256, 128) if m % c == 0] or [m]):
        io = (_nbytes((cand, tk), x2d.dtype) + _nbytes((tk, n), w.dtype)
              + 3 * _nbytes((1, n), jnp.float32) + _nbytes((cand, n), res2d.dtype)
              + _nbytes((cand, n), jnp.bfloat16))
        scratch = _nbytes((cand, n), jnp.float32)
        if 2 * io + scratch <= VMEM_BUDGET:
            tm = cand
            break
    if tm is None:
        return add_layernorm(linear(x2d, w, b), res2d, gamma, beta, eps)
    kern = functools.partial(_linear_addln_kernel, eps=eps)
    return pl.pallas_call(
        kern,
        out_shape=jax.ShapeDtypeStruct((m, n), jnp.bfloat16),
        grid=(m // tm, kdim // tk),
        in_specs=[
            pl.BlockSpec((tm, tk), lambda i, kk: (i, kk)),
            pl.BlockSpec((tk, n), lambda i, kk: (kk, 0)),
            pl.BlockSpec((1, n), lambda i, kk: (0, 0)),
            pl.BlockSpec((tm, n), lambda i, kk: (i, 0)),
            pl.BlockSpec((1, n), lambda i, kk: (0, 0)),
            pl.BlockSpec((1, n), lambda i, kk: (0, 0)),
        ],
        out_specs=pl.BlockSpec((tm, n), lambda i, kk: (i, 0)),
        scratch_shapes=[pltpu.VMEM((tm, n), jnp.float32)],
        compiler_params=pltpu.CompilerParams(
            dimension_semantics=("parallel", "arbitrary"),
            vmem_limit_bytes=VMEM_LIMIT),
    )(x2d, w, b.reshape(1, n), res2d, gamma.reshape(1, n), beta.reshape(1, n))


def _ffn_addln_kernel(x_ref, w1_ref, b1_ref, w2_ref, b2_ref, g_ref, bln_ref,
                      o_ref, *, eps):
    """Fused FFN + residual + LayerNorm: LN(relu(x@w1+b1)@w2 + b2 + x). bf16 dots, f32 LN."""
    x = x_ref[...]
    h = jnp.dot(x, w1_ref[...], preferred_element_type=jnp.float32) + b1_ref[...]
    h = jnp.maximum(h, 0.0).astype(jnp.bfloat16)
    y = (jnp.dot(h, w2_ref[...], preferred_element_type=jnp.float32)
         + b2_ref[...] + x.astype(jnp.float32))
    mean = jnp.mean(y, axis=-1, keepdims=True)
    var = jnp.mean((y - mean) ** 2, axis=-1, keepdims=True)
    o_ref[...] = ((y - mean) * lax.rsqrt(var + eps) * g_ref[...]
                  + bln_ref[...]).astype(o_ref.dtype)


def ffn_addln(x2d, w1, b1, w2, b2, gamma, beta, eps=LN_EPS):
    m, d = x2d.shape
    dff = w1.shape[1]
    tm = None
    for cand in ([c for c in (256, 128) if m % c == 0] or [m]):  # cap tm: h=[tm,dff] f32
        io = (_nbytes((cand, d), x2d.dtype) + _nbytes((d, dff), w1.dtype)
              + _nbytes((1, dff), jnp.float32) + _nbytes((dff, d), w2.dtype)
              + 3 * _nbytes((1, d), jnp.float32) + _nbytes((cand, d), jnp.bfloat16))
        scratch = _nbytes((cand, dff), jnp.float32) + _nbytes((cand, d), jnp.float32)
        if 2 * io + scratch <= VMEM_BUDGET:
            tm = cand
            break
    if tm is None:
        # TODO(synk): pipeline the dff dimension inside the kernel (pltpu.emit_pipeline)
        # instead of paying the [M,dff] HBM round-trip on very large ffn_hidden.
        h = linear(x2d, w1, b1, activation="relu")
        return linear_add_ln(h, w2, b2, x2d, gamma, beta, eps)
    kern = functools.partial(_ffn_addln_kernel, eps=eps)
    return pl.pallas_call(
        kern,
        out_shape=jax.ShapeDtypeStruct((m, d), jnp.bfloat16),
        grid=(m // tm,),
        in_specs=[
            pl.BlockSpec((tm, d), lambda i: (i, 0)),
            pl.BlockSpec((d, dff), lambda i: (0, 0)),
            pl.BlockSpec((1, dff), lambda i: (0, 0)),
            pl.BlockSpec((dff, d), lambda i: (0, 0)),
            pl.BlockSpec((1, d), lambda i: (0, 0)),
            pl.BlockSpec((1, d), lambda i: (0, 0)),
            pl.BlockSpec((1, d), lambda i: (0, 0)),
        ],
        out_specs=pl.BlockSpec((tm, d), lambda i: (i, 0)),
        compiler_params=pltpu.CompilerParams(
            dimension_semantics=("parallel",),
            vmem_limit_bytes=VMEM_LIMIT),
    )(x2d, w1, b1.reshape(1, dff), w2, b2.reshape(1, d),
      gamma.reshape(1, d), beta.reshape(1, d))


def _attention_kernel(q_ref, k_ref, v_ref, m_ref, o_ref, *, n_head, scale):
    """Multi-head scaled-dot-product attention for one (batch, Sq-tile) program.
    q:[tq,D] k,v:[Sk,D] bf16, mask:[tq,Sk] (1=keep, 0=mask). Heads handled as static
    lane slices; each head's output is stored directly into o_ref (no concatenate);
    score matmul contracts Dh via dot_general (no in-kernel transpose)."""
    _, d = q_ref.shape
    dh = d // n_head
    q = q_ref[...]
    k = k_ref[...]
    v = v_ref[...]
    keep = m_ref[...] > 0.0
    for h in range(n_head):
        lo = h * dh
        qh = q[:, lo:lo + dh]
        kh = k[:, lo:lo + dh]
        vh = v[:, lo:lo + dh]
        s = lax.dot_general(qh, kh, (((1,), (1,)), ((), ())),
                            preferred_element_type=jnp.float32) * scale
        s = jnp.where(keep, s, NEG_INF)
        s = s - jnp.max(s, axis=-1, keepdims=True)
        p = jnp.exp(s)
        p = p / jnp.sum(p, axis=-1, keepdims=True)
        oh = jnp.dot(p.astype(v.dtype), vh, preferred_element_type=jnp.float32)
        o_ref[:, lo:lo + dh] = oh.astype(o_ref.dtype)


def attention(q, k, v, mask3d, n_head):
    """q:[B,Sq,D] k,v:[B,Sk,D] (bf16) mask3d:[B,Sq,Sk] -> [B,Sq,D] bf16."""
    b, sq, d = q.shape
    sk = k.shape[1]
    assert d % n_head == 0, "n_head must divide dim"
    scale = 1.0 / math.sqrt(d // n_head)

    # Pick an Sq tile so this program's blocks fit VMEM (both grid axes are parallel).
    tq = None
    for cand in ([c for c in (512, 256, 128) if sq % c == 0] or [sq]):
        io = (2 * _nbytes((cand, d), q.dtype) + 2 * _nbytes((sk, d), k.dtype)
              + _nbytes((cand, sk), mask3d.dtype))
        scratch = _nbytes((cand, sk), jnp.float32)  # f32 score matrix
        if 2 * io + scratch <= VMEM_BUDGET:
            tq = cand
            break
    if tq is None:
        # TODO(synk): flash-style online-softmax over Sk blocks for very long sequences.
        tq = ([c for c in (512, 256, 128) if sq % c == 0] or [sq])[-1]

    kern = functools.partial(_attention_kernel, n_head=n_head, scale=scale)
    return pl.pallas_call(
        kern,
        out_shape=jax.ShapeDtypeStruct((b, sq, d), jnp.bfloat16),
        grid=(b, sq // tq),
        in_specs=[
            pl.BlockSpec((None, tq, d), lambda bi, qi: (bi, qi, 0)),
            pl.BlockSpec((None, sk, d), lambda bi, qi: (bi, 0, 0)),
            pl.BlockSpec((None, sk, d), lambda bi, qi: (bi, 0, 0)),
            pl.BlockSpec((None, tq, sk), lambda bi, qi: (bi, qi, 0)),
        ],
        out_specs=pl.BlockSpec((None, tq, d), lambda bi, qi: (bi, qi, 0)),
        compiler_params=pltpu.CompilerParams(
            dimension_semantics=("parallel", "parallel"),
            vmem_limit_bytes=VMEM_LIMIT),
    )(q, k, v, mask3d)


# ----------------------------------------------------------------------------
# Model glue (plain JAX) built on the Pallas kernels above
# ----------------------------------------------------------------------------

def decoder_layer(x, enc, trg_mask3d, src_mask3d, p, n_head):
    # TODO(synk): dropout layers are identity (deterministic eval-mode forward).
    b, s, d = x.shape
    x2d = x.reshape(-1, d)

    # ---- masked self-attention (pre-fused QKV projection) ----
    sa = p["self_attn"]
    qkv = linear(x2d, sa["wqkv"], sa["bqkv"]).reshape(b, s, 3 * d)
    q, k, v = qkv[..., :d], qkv[..., d:2 * d], qkv[..., 2 * d:]
    o = attention(q, k, v, trg_mask3d, n_head)
    # output projection fused with residual add + LayerNorm
    x2d = linear_add_ln(o.reshape(-1, d), sa["wo"], sa["bo"], x2d,
                        p["ln1_g"], p["ln1_b"])

    # ---- cross attention over encoder output (pre-fused K/V projection) ----
    if enc is not None:
        ca = p["cross_attn"]
        se = enc.shape[1]
        q = linear(x2d, ca["wq"], ca["bq"]).reshape(b, s, d)
        kv = linear(enc.reshape(-1, d), ca["wkv"], ca["bkv"]).reshape(b, se, 2 * d)
        k, v = kv[..., :d], kv[..., d:]
        o = attention(q, k, v, src_mask3d, n_head)
        x2d = linear_add_ln(o.reshape(-1, d), ca["wo"], ca["bo"], x2d,
                            p["ln2_g"], p["ln2_b"])

    # ---- position-wise FFN fused with residual add + LayerNorm ----
    x2d = ffn_addln(x2d, p["ffn_w1"], p["ffn_b1"], p["ffn_w2"], p["ffn_b2"],
                    p["ln3_g"], p["ln3_b"])
    return x2d.reshape(b, s, d)


def custom_decoder_forward(trg_tokens, enc, trg_mask, src_mask, params, n_head, vocab_size):
    b, s = trg_tokens.shape
    d = params["embed"].shape[1]
    # TODO(synk): embedding gather + sinusoidal PE add are left to XLA (no Pallas gather here).
    x = jnp.take(params["embed"], trg_tokens, axis=0) + params["pe"][:s][None, :, :]
    x = x.astype(jnp.bfloat16)
    enc_bf = None if enc is None else enc.astype(jnp.bfloat16)
    trg_m = trg_mask[:, 0]   # [B, Sq, Sq]
    src_m = src_mask[:, 0]   # [B, Sq, Sk]
    for lp in params["layers"]:
        x = decoder_layer(x, enc_bf, trg_m, src_m, lp, n_head)
    # final vocab projection: weights pre-padded to a lane multiple at init; kernel writes
    # only the valid columns (no post-kernel full-logits slice copy when it fits one N tile).
    logits = linear(x.reshape(-1, d), params["w_out"], params["b_out"],
                    out_dtype=jnp.float32, valid_n=vocab_size)
    return logits.reshape(b, s, vocab_size)


custom_decoder_forward_jit = jax.jit(custom_decoder_forward, static_argnums=(5, 6))


# ----------------------------------------------------------------------------
# Deterministic parameter construction (weights pre-fused / pre-padded, bf16)
# ----------------------------------------------------------------------------

def make_sinusoid_pe(max_len, dim):
    pos = jnp.arange(max_len, dtype=jnp.float32)[:, None]
    i = jnp.arange(0, dim, 2, dtype=jnp.float32)
    div = jnp.exp(-(jnp.log(10000.0)) * i / dim)
    pe = jnp.zeros((max_len, dim), jnp.float32)
    pe = pe.at[:, 0::2].set(jnp.sin(pos * div))
    pe = pe.at[:, 1::2].set(jnp.cos(pos * div))
    return pe


def init_params(key, vocab_size, max_len, dim, ffn_hidden, n_layers):
    wdt = jnp.bfloat16

    def dense(k, din, dout):
        return (jax.random.normal(k, (din, dout), jnp.float32) * 0.02,
                jnp.zeros((dout,), jnp.float32))

    keys = jax.random.split(key, 2 + n_layers)
    embed = jax.random.normal(keys[0], (vocab_size, dim), jnp.float32) * 0.02
    embed = embed.at[1].set(0.0)  # padding_idx=1
    w_out, b_out = dense(keys[1], dim, vocab_size)
    vpad = ((vocab_size + 127) // 128) * 128
    w_out = jnp.pad(w_out, ((0, 0), (0, vpad - vocab_size))).astype(wdt)
    b_out = jnp.pad(b_out, (0, vpad - vocab_size))

    layers = []
    for li in range(n_layers):
        lk = jax.random.split(keys[2 + li], 4)

        def mha_raw(k4):
            kq, kk, kv, ko = jax.random.split(k4, 4)
            return dense(kq, dim, dim), dense(kk, dim, dim), dense(kv, dim, dim), dense(ko, dim, dim)

        (wq, bq), (wk, bk), (wv, bv), (wo, bo) = mha_raw(lk[0])
        self_attn = dict(
            wqkv=jnp.concatenate([wq, wk, wv], axis=1).astype(wdt),
            bqkv=jnp.concatenate([bq, bk, bv], axis=0),
            wo=wo.astype(wdt), bo=bo)

        (wq, bq), (wk, bk), (wv, bv), (wo, bo) = mha_raw(lk[1])
        cross_attn = dict(
            wq=wq.astype(wdt), bq=bq,
            wkv=jnp.concatenate([wk, wv], axis=1).astype(wdt),
            bkv=jnp.concatenate([bk, bv], axis=0),
            wo=wo.astype(wdt), bo=bo)

        w1, b1 = dense(lk[2], dim, ffn_hidden)
        w2, b2 = dense(lk[3], ffn_hidden, dim)
        layers.append(dict(
            self_attn=self_attn,
            cross_attn=cross_attn,
            ffn_w1=w1.astype(wdt), ffn_b1=b1, ffn_w2=w2.astype(wdt), ffn_b2=b2,
            ln1_g=jnp.ones((dim,), jnp.float32), ln1_b=jnp.zeros((dim,), jnp.float32),
            ln2_g=jnp.ones((dim,), jnp.float32), ln2_b=jnp.zeros((dim,), jnp.float32),
            ln3_g=jnp.ones((dim,), jnp.float32), ln3_b=jnp.zeros((dim,), jnp.float32),
        ))

    return dict(embed=embed, pe=make_sinusoid_pe(max_len, dim),
                layers=layers, w_out=w_out, b_out=b_out)


# ----------------------------------------------------------------------------
# Demo
# ----------------------------------------------------------------------------

if __name__ == "__main__":
    vocab_size = 50
    max_len = 16
    dim = 32
    ffn_hidden = 64
    n_head = 4
    n_layers = 2
    B, S_trg, S_src = 2, 8, 8

    root = jax.random.PRNGKey(0)
    k_par, k_trg, k_enc = jax.random.split(root, 3)

    params = init_params(k_par, vocab_size, max_len, dim, ffn_hidden, n_layers)

    trg = jax.random.randint(k_trg, (B, S_trg), 0, vocab_size, dtype=jnp.int32)
    enc = jax.random.normal(k_enc, (B, S_src, dim), jnp.float32)

    # causal target mask, all-ones source mask (1=keep, 0=mask)
    trg_mask = jnp.broadcast_to(
        jnp.tril(jnp.ones((S_trg, S_trg), jnp.float32))[None, None],
        (B, 1, S_trg, S_trg))
    src_mask = jnp.ones((B, 1, S_trg, S_src), jnp.float32)

    out = custom_decoder_forward_jit(trg, enc, trg_mask, src_mask, params,
                                     n_head, vocab_size)
    out = jax.block_until_ready(out)

    assert out.shape == (B, S_trg, vocab_size), out.shape
    assert bool(jnp.all(jnp.isfinite(out)))
    print("KERNEL_OK")
</pallas_src>

<mosaic_0001>
module attributes {stable_mosaic.version = 11 : i64} {
  func.func @_attention_kernel(%arg0: i32, %arg1: i32, %arg2: memref<1x8x32xbf16, #tpu.memory_space<vmem>>, %arg3: memref<1x8x32xbf16, #tpu.memory_space<vmem>>, %arg4: memref<1x8x32xbf16, #tpu.memory_space<vmem>>, %arg5: memref<1x8x8xf32, #tpu.memory_space<vmem>>, %arg6: memref<1x8x32xbf16, #tpu.memory_space<vmem>>) attributes {dimension_semantics = [#tpu.dimension_semantics<parallel>, #tpu.dimension_semantics<parallel>], iteration_bounds = array<i64: 2, 1>, scalar_prefetch = 0 : i64, scratch_operands = 0 : i64, tpu.core_type = #tpu.core_type<tc>, window_params = [{transform_indices = @transform_0, window_bounds = array<i64: 1, 8, 32>}, {transform_indices = @transform_1, window_bounds = array<i64: 1, 8, 32>}, {transform_indices = @transform_2, window_bounds = array<i64: 1, 8, 32>}, {transform_indices = @transform_3, window_bounds = array<i64: 1, 8, 8>}, {transform_indices = @transform_4, window_bounds = array<i64: 1, 8, 32>}]} {
    %c0 = arith.constant 0 : index
    %c0_0 = arith.constant 0 : index
    %c0_1 = arith.constant 0 : index
    %0 = vector.load %arg2[%c0, %c0_0, %c0_1] : memref<1x8x32xbf16, #tpu.memory_space<vmem>>, vector<1x8x32xbf16>
    %1 = vector.shape_cast %0 : vector<1x8x32xbf16> to vector<8x32xbf16>
    %c0_2 = arith.constant 0 : index
    %c0_3 = arith.constant 0 : index
    %c0_4 = arith.constant 0 : index
    %2 = vector.load %arg3[%c0_2, %c0_3, %c0_4] : memref<1x8x32xbf16, #tpu.memory_space<vmem>>, vector<1x8x32xbf16>
    %3 = vector.shape_cast %2 : vector<1x8x32xbf16> to vector<8x32xbf16>
    %c0_5 = arith.constant 0 : index
    %c0_6 = arith.constant 0 : index
    %c0_7 = arith.constant 0 : index
    %4 = vector.load %arg4[%c0_5, %c0_6, %c0_7] : memref<1x8x32xbf16, #tpu.memory_space<vmem>>, vector<1x8x32xbf16>
    %5 = vector.shape_cast %4 : vector<1x8x32xbf16> to vector<8x32xbf16>
    %c0_8 = arith.constant 0 : index
    %c0_9 = arith.constant 0 : index
    %c0_10 = arith.constant 0 : index
    %6 = vector.load %arg5[%c0_8, %c0_9, %c0_10] : memref<1x8x8xf32, #tpu.memory_space<vmem>>, vector<1x8x8xf32>
    %7 = vector.shape_cast %6 : vector<1x8x8xf32> to vector<8x8xf32>
    %cst = arith.constant 0.000000e+00 : f32
    %8 = vector.broadcast %cst : f32 to vector<8x8xf32>
    %9 = arith.cmpf ogt, %7, %8 : vector<8x8xf32>
    %10 = vector.extract_strided_slice %1 {offsets = [0, 0], sizes = [8, 8], strides = [1, 1]} : vector<8x32xbf16> to vector<8x8xbf16>
    %11 = vector.extract_strided_slice %3 {offsets = [0, 0], sizes = [8, 8], strides = [1, 1]} : vector<8x32xbf16> to vector<8x8xbf16>
    %12 = vector.extract_strided_slice %5 {offsets = [0, 0], sizes = [8, 8], strides = [1, 1]} : vector<8x32xbf16> to vector<8x8xbf16>
    %cst_11 = arith.constant dense<0.000000e+00> : vector<8x8xf32>
    %13 = tpu.matmul %10, %11, %cst_11 {dimension_numbers = #tpu.dot_dimension_numbers<[1], [1], [0], [0], [0, 0, 1, 0], [], []>} : vector<8x8xbf16>, vector<8x8xbf16>, vector<8x8xf32> -> vector<8x8xf32>
    %cst_12 = arith.constant 0.353553385 : f32
    %14 = vector.broadcast %cst_12 : f32 to vector<8x8xf32>
    %15 = arith.mulf %13, %14 : vector<8x8xf32>
    %cst_13 = arith.constant -1.000000e+09 : f32
    %16 = vector.broadcast %cst_13 : f32 to vector<8x8xf32>
    %17 = arith.select %9, %15, %16 : vector<8x8xi1>, vector<8x8xf32>
    %cst_14 = arith.constant dense<0xFF800000> : vector<8xf32>
    %18 = vector.multi_reduction <maximumf>, %17, %cst_14 [1] : vector<8x8xf32> to vector<8xf32>
    %19 = vector.shape_cast %18 : vector<8xf32> to vector<8x1xf32>
    %20 = vector.broadcast %19 : vector<8x1xf32> to vector<8x8xf32>
    %21 = arith.subf %17, %20 : vector<8x8xf32>
    %22 = math.exp %21 : vector<8x8xf32>
    %cst_15 = arith.constant dense<0.000000e+00> : vector<8xf32>
    %23 = vector.multi_reduction <add>, %22, %cst_15 [1] : vector<8x8xf32> to vector<8xf32>
    %24 = vector.shape_cast %23 : vector<8xf32> to vector<8x1xf32>
    %25 = vector.broadcast %24 : vector<8x1xf32> to vector<8x8xf32>
    %26 = arith.divf %22, %25 : vector<8x8xf32>
    %27 = arith.truncf %26 : vector<8x8xf32> to vector<8x8xbf16>
    %cst_16 = arith.constant dense<0.000000e+00> : vector<8x8xf32>
    %28 = tpu.matmul %27, %12, %cst_16 {dimension_numbers = #tpu.dot_dimension_numbers<[1], [0], [0], [1], [0, 0, 1, 1], [], []>} : vector<8x8xbf16>, vector<8x8xbf16>, vector<8x8xf32> -> vector<8x8xf32>
    %29 = arith.truncf %28 : vector<8x8xf32> to vector<8x8xbf16>
    %c0_17 = arith.constant 0 : index
    %c0_18 = arith.constant 0 : index
    %c0_19 = arith.constant 0 : index
    %30 = vector.load %arg6[%c0_17, %c0_18, %c0_19] : memref<1x8x32xbf16, #tpu.memory_space<vmem>>, vector<1x8x8xbf16>
    %31 = vector.shape_cast %30 : vector<1x8x8xbf16> to vector<8x8xbf16>
    %32 = vector.shape_cast %29 : vector<8x8xbf16> to vector<1x8x8xbf16>
    tpu.vector_store %arg6[%c0_17, %c0_18, %c0_19], %32 {strides = array<i32>} : memref<1x8x32xbf16, #tpu.memory_space<vmem>>, vector<1x8x8xbf16>,
    %33 = vector.extract_strided_slice %1 {offsets = [0, 8], sizes = [8, 8], strides = [1, 1]} : vector<8x32xbf16> to vector<8x8xbf16>
    %34 = vector.extract_strided_slice %3 {offsets = [0, 8], sizes = [8, 8], strides = [1, 1]} : vector<8x32xbf16> to vector<8x8xbf16>
    %35 = vector.extract_strided_slice %5 {offsets = [0, 8], sizes = [8, 8], strides = [1, 1]} : vector<8x32xbf16> to vector<8x8xbf16>
    %cst_20 = arith.constant dense<0.000000e+00> : vector<8x8xf32>
    %36 = tpu.matmul %33, %34, %cst_20 {dimension_numbers = #tpu.dot_dimension_numbers<[1], [1], [0], [0], [0, 0, 1, 0], [], []>} : vector<8x8xbf16>, vector<8x8xbf16>, vector<8x8xf32> -> vector<8x8xf32>
    %cst_21 = arith.constant 0.353553385 : f32
    %37 = vector.broadcast %cst_21 : f32 to vector<8x8xf32>
    %38 = arith.mulf %36, %37 : vector<8x8xf32>
    %cst_22 = arith.constant -1.000000e+09 : f32
    %39 = vector.broadcast %cst_22 : f32 to vector<8x8xf32>
    %40 = arith.select %9, %38, %39 : vector<8x8xi1>, vector<8x8xf32>
    %cst_23 = arith.constant dense<0xFF800000> : vector<8xf32>
    %41 = vector.multi_reduction <maximumf>, %40, %cst_23 [1] : vector<8x8xf32> to vector<8xf32>
    %42 = vector.shape_cast %41 : vector<8xf32> to vector<8x1xf32>
    %43 = vector.broadcast %42 : vector<8x1xf32> to vector<8x8xf32>
    %44 = arith.subf %40, %43 : vector<8x8xf32>
    %45 = math.exp %44 : vector<8x8xf32>
    %cst_24 = arith.constant dense<0.000000e+00> : vector<8xf32>
    %46 = vector.multi_reduction <add>, %45, %cst_24 [1] : vector<8x8xf32> to vector<8xf32>
    %47 = vector.shape_cast %46 : vector<8xf32> to vector<8x1xf32>
    %48 = vector.broadcast %47 : vector<8x1xf32> to vector<8x8xf32>
    %49 = arith.divf %45, %48 : vector<8x8xf32>
    %50 = arith.truncf %49 : vector<8x8xf32> to vector<8x8xbf16>
    %cst_25 = arith.constant dense<0.000000e+00> : vector<8x8xf32>
    %51 = tpu.matmul %50, %35, %cst_25 {dimension_numbers = #tpu.dot_dimension_numbers<[1], [0], [0], [1], [0, 0, 1, 1], [], []>} : vector<8x8xbf16>, vector<8x8xbf16>, vector<8x8xf32> -> vector<8x8xf32>
    %52 = arith.truncf %51 : vector<8x8xf32> to vector<8x8xbf16>
    %c0_26 = arith.constant 0 : index
    %c0_27 = arith.constant 0 : index
    %c8 = arith.constant 8 : index
    %53 = vector.load %arg6[%c0_26, %c0_27, %c8] : memref<1x8x32xbf16, #tpu.memory_space<vmem>>, vector<1x8x8xbf16>
    %54 = vector.shape_cast %53 : vector<1x8x8xbf16> to vector<8x8xbf16>
    %55 = vector.shape_cast %52 : vector<8x8xbf16> to vector<1x8x8xbf16>
    tpu.vector_store %arg6[%c0_26, %c0_27, %c8], %55 {strides = array<i32>} : memref<1x8x32xbf16, #tpu.memory_space<vmem>>, vector<1x8x8xbf16>,
    %56 = vector.extract_strided_slice %1 {offsets = [0, 16], sizes = [8, 8], strides = [1, 1]} : vector<8x32xbf16> to vector<8x8xbf16>
    %57 = vector.extract_strided_slice %3 {offsets = [0, 16], sizes = [8, 8], strides = [1, 1]} : vector<8x32xbf16> to vector<8x8xbf16>
    %58 = vector.extract_strided_slice %5 {offsets = [0, 16], sizes = [8, 8], strides = [1, 1]} : vector<8x32xbf16> to vector<8x8xbf16>
    %cst_28 = arith.constant dense<0.000000e+00> : vector<8x8xf32>
    %59 = tpu.matmul %56, %57, %cst_28 {dimension_numbers = #tpu.dot_dimension_numbers<[1], [1], [0], [0], [0, 0, 1, 0], [], []>} : vector<8x8xbf16>, vector<8x8xbf16>, vector<8x8xf32> -> vector<8x8xf32>
    %cst_29 = arith.constant 0.353553385 : f32
    %60 = vector.broadcast %cst_29 : f32 to vector<8x8xf32>
    %61 = arith.mulf %59, %60 : vector<8x8xf32>
    %cst_30 = arith.constant -1.000000e+09 : f32
    %62 = vector.broadcast %cst_30 : f32 to vector<8x8xf32>
    %63 = arith.select %9, %61, %62 : vector<8x8xi1>, vector<8x8xf32>
    %cst_31 = arith.constant dense<0xFF800000> : vector<8xf32>
    %64 = vector.multi_reduction <maximumf>, %63, %cst_31 [1] : vector<8x8xf32> to vector<8xf32>
    %65 = vector.shape_cast %64 : vector<8xf32> to vector<8x1xf32>
    %66 = vector.broadcast %65 : vector<8x1xf32> to vector<8x8xf32>
    %67 = arith.subf %63, %66 : vector<8x8xf32>
    %68 = math.exp %67 : vector<8x8xf32>
    %cst_32 = arith.constant dense<0.000000e+00> : vector<8xf32>
    %69 = vector.multi_reduction <add>, %68, %cst_32 [1] : vector<8x8xf32> to vector<8xf32>
    %70 = vector.shape_cast %69 : vector<8xf32> to vector<8x1xf32>
    %71 = vector.broadcast %70 : vector<8x1xf32> to vector<8x8xf32>
    %72 = arith.divf %68, %71 : vector<8x8xf32>
    %73 = arith.truncf %72 : vector<8x8xf32> to vector<8x8xbf16>
    %cst_33 = arith.constant dense<0.000000e+00> : vector<8x8xf32>
    %74 = tpu.matmul %73, %58, %cst_33 {dimension_numbers = #tpu.dot_dimension_numbers<[1], [0], [0], [1], [0, 0, 1, 1], [], []>} : vector<8x8xbf16>, vector<8x8xbf16>, vector<8x8xf32> -> vector<8x8xf32>
    %75 = arith.truncf %74 : vector<8x8xf32> to vector<8x8xbf16>
    %c0_34 = arith.constant 0 : index
    %c0_35 = arith.constant 0 : index
    %c16 = arith.constant 16 : index
    %76 = vector.load %arg6[%c0_34, %c0_35, %c16] : memref<1x8x32xbf16, #tpu.memory_space<vmem>>, vector<1x8x8xbf16>
    %77 = vector.shape_cast %76 : vector<1x8x8xbf16> to vector<8x8xbf16>
    %78 = vector.shape_cast %75 : vector<8x8xbf16> to vector<1x8x8xbf16>
    tpu.vector_store %arg6[%c0_34, %c0_35, %c16], %78 {strides = array<i32>} : memref<1x8x32xbf16, #tpu.memory_space<vmem>>, vector<1x8x8xbf16>,
    %79 = vector.extract_strided_slice %1 {offsets = [0, 24], sizes = [8, 8], strides = [1, 1]} : vector<8x32xbf16> to vector<8x8xbf16>
    %80 = vector.extract_strided_slice %3 {offsets = [0, 24], sizes = [8, 8], strides = [1, 1]} : vector<8x32xbf16> to vector<8x8xbf16>
    %81 = vector.extract_strided_slice %5 {offsets = [0, 24], sizes = [8, 8], strides = [1, 1]} : vector<8x32xbf16> to vector<8x8xbf16>
    %cst_36 = arith.constant dense<0.000000e+00> : vector<8x8xf32>
    %82 = tpu.matmul %79, %80, %cst_36 {dimension_numbers = #tpu.dot_dimension_numbers<[1], [1], [0], [0], [0, 0, 1, 0], [], []>} : vector<8x8xbf16>, vector<8x8xbf16>, vector<8x8xf32> -> vector<8x8xf32>
    %cst_37 = arith.constant 0.353553385 : f32
    %83 = vector.broadcast %cst_37 : f32 to vector<8x8xf32>
    %84 = arith.mulf %82, %83 : vector<8x8xf32>
    %cst_38 = arith.constant -1.000000e+09 : f32
    %85 = vector.broadcast %cst_38 : f32 to vector<8x8xf32>
    %86 = arith.select %9, %84, %85 : vector<8x8xi1>, vector<8x8xf32>
    %cst_39 = arith.constant dense<0xFF800000> : vector<8xf32>
    %87 = vector.multi_reduction <maximumf>, %86, %cst_39 [1] : vector<8x8xf32> to vector<8xf32>
    %88 = vector.shape_cast %87 : vector<8xf32> to vector<8x1xf32>
    %89 = vector.broadcast %88 : vector<8x1xf32> to vector<8x8xf32>
    %90 = arith.subf %86, %89 : vector<8x8xf32>
    %91 = math.exp %90 : vector<8x8xf32>
    %cst_40 = arith.constant dense<0.000000e+00> : vector<8xf32>
    %92 = vector.multi_reduction <add>, %91, %cst_40 [1] : vector<8x8xf32> to vector<8xf32>
    %93 = vector.shape_cast %92 : vector<8xf32> to vector<8x1xf32>
    %94 = vector.broadcast %93 : vector<8x1xf32> to vector<8x8xf32>
    %95 = arith.divf %91, %94 : vector<8x8xf32>
    %96 = arith.truncf %95 : vector<8x8xf32> to vector<8x8xbf16>
    %cst_41 = arith.constant dense<0.000000e+00> : vector<8x8xf32>
    %97 = tpu.matmul %96, %81, %cst_41 {dimension_numbers = #tpu.dot_dimension_numbers<[1], [0], [0], [1], [0, 0, 1, 1], [], []>} : vector<8x8xbf16>, vector<8x8xbf16>, vector<8x8xf32> -> vector<8x8xf32>
    %98 = arith.truncf %97 : vector<8x8xf32> to vector<8x8xbf16>
    %c0_42 = arith.constant 0 : index
    %c0_43 = arith.constant 0 : index
    %c24 = arith.constant 24 : index
    %99 = vector.load %arg6[%c0_42, %c0_43, %c24] : memref<1x8x32xbf16, #tpu.memory_space<vmem>>, vector<1x8x8xbf16>
    %100 = vector.shape_cast %99 : vector<1x8x8xbf16> to vector<8x8xbf16>
    %101 = vector.shape_cast %98 : vector<8x8xbf16> to vector<1x8x8xbf16>
    tpu.vector_store %arg6[%c0_42, %c0_43, %c24], %101 {strides = array<i32>} : memref<1x8x32xbf16, #tpu.memory_space<vmem>>, vector<1x8x8xbf16>,
    return
  }
  func.func @transform_0(%arg0: i32, %arg1: i32) -> (i32, i32, i32) {
    %c0_i32 = arith.constant 0 : i32
    %c0_i32_0 = arith.constant 0 : i32
    return %arg0, %arg1, %c0_i32 : i32, i32, i32
  }
  func.func @transform_1(%arg0: i32, %arg1: i32) -> (i32, i32, i32) {
    %c0_i32 = arith.constant 0 : i32
    %c0_i32_0 = arith.constant 0 : i32
    %c0_i32_1 = arith.constant 0 : i32
    return %arg0, %c0_i32, %c0_i32_0 : i32, i32, i32
  }
  func.func @transform_2(%arg0: i32, %arg1: i32) -> (i32, i32, i32) {
    %c0_i32 = arith.constant 0 : i32
    %c0_i32_0 = arith.constant 0 : i32
    %c0_i32_1 = arith.constant 0 : i32
    return %arg0, %c0_i32, %c0_i32_0 : i32, i32, i32
  }
  func.func @transform_3(%arg0: i32, %arg1: i32) -> (i32, i32, i32) {
    %c0_i32 = arith.constant 0 : i32
    %c0_i32_0 = arith.constant 0 : i32
    return %arg0, %arg1, %c0_i32 : i32, i32, i32
  }
  func.func @transform_4(%arg0: i32, %arg1: i32) -> (i32, i32, i32) {
    %c0_i32 = arith.constant 0 : i32
    %c0_i32_0 = arith.constant 0 : i32
    return %arg0, %arg1, %c0_i32 : i32, i32, i32
  }
}

module attributes {stable_mosaic.version = 11 : i64} {
  func.func @_linear_kernel(%arg0: i32, %arg1: i32, %arg2: i32, %arg3: memref<16x32xbf16, #tpu.memory_space<vmem>>, %arg4: memref<32x96xbf16, #tpu.memory_space<vmem>>, %arg5: memref<1x96xf32, #tpu.memory_space<vmem>>, %arg6: memref<16x96xbf16, #tpu.memory_space<vmem>>, %arg7: memref<16x96xf32, #tpu.memory_space<vmem>>) attributes {dimension_semantics = [#tpu.dimension_semantics<parallel>, #tpu.dimension_semantics<parallel>, #tpu.dimension_semantics<arbitrary>], iteration_bounds = array<i64: 1, 1, 1>, scalar_prefetch = 0 : i64, scratch_operands = 1 : i64, tpu.core_type = #tpu.core_type<tc>, window_params = [{transform_indices = @transform_0, window_bounds = array<i64: 16, 32>}, {transform_indices = @transform_1, window_bounds = array<i64: 32, 96>}, {transform_indices = @transform_2, window_bounds = array<i64: 1, 96>}, {transform_indices = @transform_3, window_bounds = array<i64: 16, 96>}]} {
    %c0_i32 = arith.constant 0 : i32
    %0 = arith.cmpi eq, %arg2, %c0_i32 : i32
    %1 = arith.extui %0 : i1 to i32
    %c0_i32_0 = arith.constant 0 : i32
    %2 = arith.cmpi ne, %1, %c0_i32_0 : i32
    scf.if %2 {
      %cst_10 = arith.constant 0.000000e+00 : f32
      %12 = vector.broadcast %cst_10 : f32 to vector<16x96xf32>
      %c0_11 = arith.constant 0 : index
      %c0_12 = arith.constant 0 : index
      %13 = vector.load %arg7[%c0_11, %c0_12] : memref<16x96xf32, #tpu.memory_space<vmem>>, vector<16x96xf32>
      tpu.vector_store %arg7[%c0_11, %c0_12], %12 {strides = array<i32>} : memref<16x96xf32, #tpu.memory_space<vmem>>, vector<16x96xf32>,
    } else {
    }
    %c0 = arith.constant 0 : index
    %c0_1 = arith.constant 0 : index
    %3 = vector.load %arg7[%c0, %c0_1] : memref<16x96xf32, #tpu.memory_space<vmem>>, vector<16x96xf32>
    %c0_2 = arith.constant 0 : index
    %c0_3 = arith.constant 0 : index
    %4 = vector.load %arg3[%c0_2, %c0_3] : memref<16x32xbf16, #tpu.memory_space<vmem>>, vector<16x32xbf16>
    %c0_4 = arith.constant 0 : index
    %c0_5 = arith.constant 0 : index
    %5 = vector.load %arg4[%c0_4, %c0_5] : memref<32x96xbf16, #tpu.memory_space<vmem>>, vector<32x96xbf16>
    %cst = arith.constant dense<0.000000e+00> : vector<16x96xf32>
    %6 = tpu.matmul %4, %5, %cst {dimension_numbers = #tpu.dot_dimension_numbers<[1], [0], [0], [1], [0, 0, 1, 1], [], []>} : vector<16x32xbf16>, vector<32x96xbf16>, vector<16x96xf32> -> vector<16x96xf32>
    %7 = arith.addf %3, %6 : vector<16x96xf32>
    %c0_6 = arith.constant 0 : index
    %c0_7 = arith.constant 0 : index
    %8 = vector.load %arg7[%c0_6, %c0_7] : memref<16x96xf32, #tpu.memory_space<vmem>>, vector<16x96xf32>
    tpu.vector_store %arg7[%c0_6, %c0_7], %7 {strides = array<i32>} : memref<16x96xf32, #tpu.memory_space<vmem>>, vector<16x96xf32>,
    %c0_i32_8 = arith.constant 0 : i32
    %9 = arith.cmpi eq, %arg2, %c0_i32_8 : i32
    %10 = arith.extui %9 : i1 to i32
    %c0_i32_9 = arith.constant 0 : i32
    %11 = arith.cmpi ne, %10, %c0_i32_9 : i32
    scf.if %11 {
      %c0_10 = arith.constant 0 : index
      %c0_11 = arith.constant 0 : index
      %12 = vector.load %arg7[%c0_10, %c0_11] : memref<16x96xf32, #tpu.memory_space<vmem>>, vector<16x96xf32>
      %c0_12 = arith.constant 0 : index
      %c0_13 = arith.constant 0 : index
      %13 = vector.load %arg5[%c0_12, %c0_13] : memref<1x96xf32, #tpu.memory_space<vmem>>, vector<1x96xf32>
      %14 = vector.broadcast %13 : vector<1x96xf32> to vector<16x96xf32>
      %15 = arith.addf %12, %14 : vector<16x96xf32>
      %16 = arith.truncf %15 : vector<16x96xf32> to vector<16x96xbf16>
      %c0_14 = arith.constant 0 : index
      %c0_15 = arith.constant 0 : index
      %17 = vector.load %arg6[%c0_14, %c0_15] : memref<16x96xbf16, #tpu.memory_space<vmem>>, vector<16x96xbf16>
      tpu.vector_store %arg6[%c0_14, %c0_15], %16 {strides = array<i32>} : memref<16x96xbf16, #tpu.memory_space<vmem>>, vector<16x96xbf16>,
    } else {
    }
    return
  }
  func.func @transform_0(%arg0: i32, %arg1: i32, %arg2: i32) -> (i32, i32) {
    %c0_i32 = arith.constant 0 : i32
    return %arg0, %arg2 : i32, i32
  }
  func.func @transform_1(%arg0: i32, %arg1: i32, %arg2: i32) -> (i32, i32) {
    %c0_i32 = arith.constant 0 : i32
    return %arg2, %arg1 : i32, i32
  }
  func.func @transform_2(%arg0: i32, %arg1: i32, %arg2: i32) -> (i32, i32) {
    %c0_i32 = arith.constant 0 : i32
    %c0_i32_0 = arith.constant 0 : i32
    return %c0_i32, %arg1 : i32, i32
  }
  func.func @transform_3(%arg0: i32, %arg1: i32, %arg2: i32) -> (i32, i32) {
    %c0_i32 = arith.constant 0 : i32
    return %arg0, %arg1 : i32, i32
  }
}

module attributes {stable_mosaic.version = 11 : i64} {
  func.func @_linear_addln_kernel(%arg0: i32, %arg1: i32, %arg2: memref<16x32xbf16, #tpu.memory_space<vmem>>, %arg3: memref<32x32xbf16, #tpu.memory_space<vmem>>, %arg4: memref<1x32xf32, #tpu.memory_space<vmem>>, %arg5: memref<16x32xbf16, #tpu.memory_space<vmem>>, %arg6: memref<1x32xf32, #tpu.memory_space<vmem>>, %arg7: memref<1x32xf32, #tpu.memory_space<vmem>>, %arg8: memref<16x32xbf16, #tpu.memory_space<vmem>>, %arg9: memref<16x32xf32, #tpu.memory_space<vmem>>) attributes {dimension_semantics = [#tpu.dimension_semantics<parallel>, #tpu.dimension_semantics<arbitrary>], iteration_bounds = array<i64: 1, 1>, scalar_prefetch = 0 : i64, scratch_operands = 1 : i64, tpu.core_type = #tpu.core_type<tc>, window_params = [{transform_indices = @transform_0, window_bounds = array<i64: 16, 32>}, {transform_indices = @transform_1, window_bounds = array<i64: 32, 32>}, {pipeline_mode = #tpu.pipeline_mode<synchronous>, transform_indices = @transform_2, window_bounds = array<i64: 1, 32>}, {transform_indices = @transform_3, window_bounds = array<i64: 16, 32>}, {pipeline_mode = #tpu.pipeline_mode<synchronous>, transform_indices = @transform_4, window_bounds = array<i64: 1, 32>}, {pipeline_mode = #tpu.pipeline_mode<synchronous>, transform_indices = @transform_5, window_bounds = array<i64: 1, 32>}, {transform_indices = @transform_6, window_bounds = array<i64: 16, 32>}]} {
    %c0_i32 = arith.constant 0 : i32
    %0 = arith.cmpi eq, %arg1, %c0_i32 : i32
    %1 = arith.extui %0 : i1 to i32
    %c0_i32_0 = arith.constant 0 : i32
    %2 = arith.cmpi ne, %1, %c0_i32_0 : i32
    scf.if %2 {
      %cst_10 = arith.constant 0.000000e+00 : f32
      %12 = vector.broadcast %cst_10 : f32 to vector<16x32xf32>
      %c0_11 = arith.constant 0 : index
      %c0_12 = arith.constant 0 : index
      %13 = vector.load %arg9[%c0_11, %c0_12] : memref<16x32xf32, #tpu.memory_space<vmem>>, vector<16x32xf32>
      tpu.vector_store %arg9[%c0_11, %c0_12], %12 {strides = array<i32>} : memref<16x32xf32, #tpu.memory_space<vmem>>, vector<16x32xf32>,
    } else {
    }
    %c0 = arith.constant 0 : index
    %c0_1 = arith.constant 0 : index
    %3 = vector.load %arg9[%c0, %c0_1] : memref<16x32xf32, #tpu.memory_space<vmem>>, vector<16x32xf32>
    %c0_2 = arith.constant 0 : index
    %c0_3 = arith.constant 0 : index
    %4 = vector.load %arg2[%c0_2, %c0_3] : memref<16x32xbf16, #tpu.memory_space<vmem>>, vector<16x32xbf16>
    %c0_4 = arith.constant 0 : index
    %c0_5 = arith.constant 0 : index
    %5 = vector.load %arg3[%c0_4, %c0_5] : memref<32x32xbf16, #tpu.memory_space<vmem>>, vector<32x32xbf16>
    %cst = arith.constant dense<0.000000e+00> : vector<16x32xf32>
    %6 = tpu.matmul %4, %5, %cst {dimension_numbers = #tpu.dot_dimension_numbers<[1], [0], [0], [1], [0, 0, 1, 1], [], []>} : vector<16x32xbf16>, vector<32x32xbf16>, vector<16x32xf32> -> vector<16x32xf32>
    %7 = arith.addf %3, %6 : vector<16x32xf32>
    %c0_6 = arith.constant 0 : index
    %c0_7 = arith.constant 0 : index
    %8 = vector.load %arg9[%c0_6, %c0_7] : memref<16x32xf32, #tpu.memory_space<vmem>>, vector<16x32xf32>
    tpu.vector_store %arg9[%c0_6, %c0_7], %7 {strides = array<i32>} : memref<16x32xf32, #tpu.memory_space<vmem>>, vector<16x32xf32>,
    %c0_i32_8 = arith.constant 0 : i32
    %9 = arith.cmpi eq, %arg1, %c0_i32_8 : i32
    %10 = arith.extui %9 : i1 to i32
    %c0_i32_9 = arith.constant 0 : i32
    %11 = arith.cmpi ne, %10, %c0_i32_9 : i32
    scf.if %11 {
      %c0_10 = arith.constant 0 : index
      %c0_11 = arith.constant 0 : index
      %12 = vector.load %arg9[%c0_10, %c0_11] : memref<16x32xf32, #tpu.memory_space<vmem>>, vector<16x32xf32>
      %c0_12 = arith.constant 0 : index
      %c0_13 = arith.constant 0 : index
      %13 = vector.load %arg4[%c0_12, %c0_13] : memref<1x32xf32, #tpu.memory_space<vmem>>, vector<1x32xf32>
      %14 = vector.broadcast %13 : vector<1x32xf32> to vector<16x32xf32>
      %15 = arith.addf %12, %14 : vector<16x32xf32>
      %c0_14 = arith.constant 0 : index
      %c0_15 = arith.constant 0 : index
      %16 = vector.load %arg5[%c0_14, %c0_15] : memref<16x32xbf16, #tpu.memory_space<vmem>>, vector<16x32xbf16>
      %17 = arith.extf %16 : vector<16x32xbf16> to vector<16x32xf32>
      %18 = arith.addf %15, %17 : vector<16x32xf32>
      %cst_16 = arith.constant dense<0.000000e+00> : vector<16xf32>
      %19 = vector.multi_reduction <add>, %18, %cst_16 [1] : vector<16x32xf32> to vector<16xf32>
      %20 = vector.shape_cast %19 : vector<16xf32> to vector<16x1xf32>
      %cst_17 = arith.constant 3.200000e+01 : f32
      %21 = vector.broadcast %cst_17 : f32 to vector<16x1xf32>
      %22 = arith.divf %20, %21 : vector<16x1xf32>
      %23 = vector.broadcast %22 : vector<16x1xf32> to vector<16x32xf32>
      %24 = arith.subf %18, %23 : vector<16x32xf32>
      %25 = arith.mulf %24, %24 : vector<16x32xf32>
      %cst_18 = arith.constant dense<0.000000e+00> : vector<16xf32>
      %26 = vector.multi_reduction <add>, %25, %cst_18 [1] : vector<16x32xf32> to vector<16xf32>
      %27 = vector.shape_cast %26 : vector<16xf32> to vector<16x1xf32>
      %cst_19 = arith.constant 3.200000e+01 : f32
      %28 = vector.broadcast %cst_19 : f32 to vector<16x1xf32>
      %29 = arith.divf %27, %28 : vector<16x1xf32>
      %30 = vector.broadcast %22 : vector<16x1xf32> to vector<16x32xf32>
      %31 = arith.subf %18, %30 : vector<16x32xf32>
      %cst_20 = arith.constant 9.99999996E-13 : f32
      %32 = vector.broadcast %cst_20 : f32 to vector<16x1xf32>
      %33 = arith.addf %29, %32 : vector<16x1xf32>
      %34 = math.rsqrt %33 : vector<16x1xf32>
      %35 = vector.broadcast %34 : vector<16x1xf32> to vector<16x32xf32>
      %36 = arith.mulf %31, %35 : vector<16x32xf32>
      %c0_21 = arith.constant 0 : index
      %c0_22 = arith.constant 0 : index
      %37 = vector.load %arg6[%c0_21, %c0_22] : memref<1x32xf32, #tpu.memory_space<vmem>>, vector<1x32xf32>
      %38 = vector.broadcast %37 : vector<1x32xf32> to vector<16x32xf32>
      %39 = arith.mulf %36, %38 : vector<16x32xf32>
      %c0_23 = arith.constant 0 : index
      %c0_24 = arith.constant 0 : index
      %40 = vector.load %arg7[%c0_23, %c0_24] : memref<1x32xf32, #tpu.memory_space<vmem>>, vector<1x32xf32>
      %41 = vector.broadcast %40 : vector<1x32xf32> to vector<16x32xf32>
      %42 = arith.addf %39, %41 : vector<16x32xf32>
      %43 = arith.truncf %42 : vector<16x32xf32> to vector<16x32xbf16>
      %c0_25 = arith.constant 0 : index
      %c0_26 = arith.constant 0 : index
      %44 = vector.load %arg8[%c0_25, %c0_26] : memref<16x32xbf16, #tpu.memory_space<vmem>>, vector<16x32xbf16>
      tpu.vector_store %arg8[%c0_25, %c0_26], %43 {strides = array<i32>} : memref<16x32xbf16, #tpu.memory_space<vmem>>, vector<16x32xbf16>,
    } else {
    }
    return
  }
  func.func @transform_0(%arg0: i32, %arg1: i32) -> (i32, i32) {
    %c0_i32 = arith.constant 0 : i32
    return %arg0, %arg1 : i32, i32
  }
  func.func @transform_1(%arg0: i32, %arg1: i32) -> (i32, i32) {
    %c0_i32 = arith.constant 0 : i32
    %c0_i32_0 = arith.constant 0 : i32
    return %arg1, %c0_i32 : i32, i32
  }
  func.func @transform_2(%arg0: i32, %arg1: i32) -> (i32, i32) {
    %c0_i32 = arith.constant 0 : i32
    %c0_i32_0 = arith.constant 0 : i32
    %c0_i32_1 = arith.constant 0 : i32
    return %c0_i32, %c0_i32_0 : i32, i32
  }
  func.func @transform_3(%arg0: i32, %arg1: i32) -> (i32, i32) {
    %c0_i32 = arith.constant 0 : i32
    %c0_i32_0 = arith.constant 0 : i32
    return %arg0, %c0_i32 : i32, i32
  }
  func.func @transform_4(%arg0: i32, %arg1: i32) -> (i32, i32) {
    %c0_i32 = arith.constant 0 : i32
    %c0_i32_0 = arith.constant 0 : i32
    %c0_i32_1 = arith.constant 0 : i32
    return %c0_i32, %c0_i32_0 : i32, i32
  }
  func.func @transform_5(%arg0: i32, %arg1: i32) -> (i32, i32) {
    %c0_i32 = arith.constant 0 : i32
    %c0_i32_0 = arith.constant 0 : i32
    %c0_i32_1 = arith.constant 0 : i32
    return %c0_i32, %c0_i32_0 : i32, i32
  }
  func.func @transform_6(%arg0: i32, %arg1: i32) -> (i32, i32) {
    %c0_i32 = arith.constant 0 : i32
    %c0_i32_0 = arith.constant 0 : i32
    return %arg0, %c0_i32 : i32, i32
  }
}

module attributes {stable_mosaic.version = 11 : i64} {
  func.func @_linear_kernel(%arg0: i32, %arg1: i32, %arg2: i32, %arg3: memref<16x32xbf16, #tpu.memory_space<vmem>>, %arg4: memref<32x32xbf16, #tpu.memory_space<vmem>>, %arg5: memref<1x32xf32, #tpu.memory_space<vmem>>, %arg6: memref<16x32xbf16, #tpu.memory_space<vmem>>, %arg7: memref<16x32xf32, #tpu.memory_space<vmem>>) attributes {dimension_semantics = [#tpu.dimension_semantics<parallel>, #tpu.dimension_semantics<parallel>, #tpu.dimension_semantics<arbitrary>], iteration_bounds = array<i64: 1, 1, 1>, scalar_prefetch = 0 : i64, scratch_operands = 1 : i64, tpu.core_type = #tpu.core_type<tc>, window_params = [{transform_indices = @transform_0, window_bounds = array<i64: 16, 32>}, {transform_indices = @transform_1, window_bounds = array<i64: 32, 32>}, {transform_indices = @transform_2, window_bounds = array<i64: 1, 32>}, {transform_indices = @transform_3, window_bounds = array<i64: 16, 32>}]} {
    %c0_i32 = arith.constant 0 : i32
    %0 = arith.cmpi eq, %arg2, %c0_i32 : i32
    %1 = arith.extui %0 : i1 to i32
    %c0_i32_0 = arith.constant 0 : i32
    %2 = arith.cmpi ne, %1, %c0_i32_0 : i32
    scf.if %2 {
      %cst_10 = arith.constant 0.000000e+00 : f32
      %12 = vector.broadcast %cst_10 : f32 to vector<16x32xf32>
      %c0_11 = arith.constant 0 : index
      %c0_12 = arith.constant 0 : index
      %13 = vector.load %arg7[%c0_11, %c0_12] : memref<16x32xf32, #tpu.memory_space<vmem>>, vector<16x32xf32>
      tpu.vector_store %arg7[%c0_11, %c0_12], %12 {strides = array<i32>} : memref<16x32xf32, #tpu.memory_space<vmem>>, vector<16x32xf32>,
    } else {
    }
    %c0 = arith.constant 0 : index
    %c0_1 = arith.constant 0 : index
    %3 = vector.load %arg7[%c0, %c0_1] : memref<16x32xf32, #tpu.memory_space<vmem>>, vector<16x32xf32>
    %c0_2 = arith.constant 0 : index
    %c0_3 = arith.constant 0 : index
    %4 = vector.load %arg3[%c0_2, %c0_3] : memref<16x32xbf16, #tpu.memory_space<vmem>>, vector<16x32xbf16>
    %c0_4 = arith.constant 0 : index
    %c0_5 = arith.constant 0 : index
    %5 = vector.load %arg4[%c0_4, %c0_5] : memref<32x32xbf16, #tpu.memory_space<vmem>>, vector<32x32xbf16>
    %cst = arith.constant dense<0.000000e+00> : vector<16x32xf32>
    %6 = tpu.matmul %4, %5, %cst {dimension_numbers = #tpu.dot_dimension_numbers<[1], [0], [0], [1], [0, 0, 1, 1], [], []>} : vector<16x32xbf16>, vector<32x32xbf16>, vector<16x32xf32> -> vector<16x32xf32>
    %7 = arith.addf %3, %6 : vector<16x32xf32>
    %c0_6 = arith.constant 0 : index
    %c0_7 = arith.constant 0 : index
    %8 = vector.load %arg7[%c0_6, %c0_7] : memref<16x32xf32, #tpu.memory_space<vmem>>, vector<16x32xf32>
    tpu.vector_store %arg7[%c0_6, %c0_7], %7 {strides = array<i32>} : memref<16x32xf32, #tpu.memory_space<vmem>>, vector<16x32xf32>,
    %c0_i32_8 = arith.constant 0 : i32
    %9 = arith.cmpi eq, %arg2, %c0_i32_8 : i32
    %10 = arith.extui %9 : i1 to i32
    %c0_i32_9 = arith.constant 0 : i32
    %11 = arith.cmpi ne, %10, %c0_i32_9 : i32
    scf.if %11 {
      %c0_10 = arith.constant 0 : index
      %c0_11 = arith.constant 0 : index
      %12 = vector.load %arg7[%c0_10, %c0_11] : memref<16x32xf32, #tpu.memory_space<vmem>>, vector<16x32xf32>
      %c0_12 = arith.constant 0 : index
      %c0_13 = arith.constant 0 : index
      %13 = vector.load %arg5[%c0_12, %c0_13] : memref<1x32xf32, #tpu.memory_space<vmem>>, vector<1x32xf32>
      %14 = vector.broadcast %13 : vector<1x32xf32> to vector<16x32xf32>
      %15 = arith.addf %12, %14 : vector<16x32xf32>
      %16 = arith.truncf %15 : vector<16x32xf32> to vector<16x32xbf16>
      %c0_14 = arith.constant 0 : index
      %c0_15 = arith.constant 0 : index
      %17 = vector.load %arg6[%c0_14, %c0_15] : memref<16x32xbf16, #tpu.memory_space<vmem>>, vector<16x32xbf16>
      tpu.vector_store %arg6[%c0_14, %c0_15], %16 {strides = array<i32>} : memref<16x32xbf16, #tpu.memory_space<vmem>>, vector<16x32xbf16>,
    } else {
    }
    return
  }
  func.func @transform_0(%arg0: i32, %arg1: i32, %arg2: i32) -> (i32, i32) {
    %c0_i32 = arith.constant 0 : i32
    return %arg0, %arg2 : i32, i32
  }
  func.func @transform_1(%arg0: i32, %arg1: i32, %arg2: i32) -> (i32, i32) {
    %c0_i32 = arith.constant 0 : i32
    return %arg2, %arg1 : i32, i32
  }
  func.func @transform_2(%arg0: i32, %arg1: i32, %arg2: i32) -> (i32, i32) {
    %c0_i32 = arith.constant 0 : i32
    %c0_i32_0 = arith.constant 0 : i32
    return %c0_i32, %arg1 : i32, i32
  }
  func.func @transform_3(%arg0: i32, %arg1: i32, %arg2: i32) -> (i32, i32) {
    %c0_i32 = arith.constant 0 : i32
    return %arg0, %arg1 : i32, i32
  }
}

module attributes {stable_mosaic.version = 11 : i64} {
  func.func @_linear_kernel(%arg0: i32, %arg1: i32, %arg2: i32, %arg3: memref<16x32xbf16, #tpu.memory_space<vmem>>, %arg4: memref<32x64xbf16, #tpu.memory_space<vmem>>, %arg5: memref<1x64xf32, #tpu.memory_space<vmem>>, %arg6: memref<16x64xbf16, #tpu.memory_space<vmem>>, %arg7: memref<16x64xf32, #tpu.memory_space<vmem>>) attributes {dimension_semantics = [#tpu.dimension_semantics<parallel>, #tpu.dimension_semantics<parallel>, #tpu.dimension_semantics<arbitrary>], iteration_bounds = array<i64: 1, 1, 1>, scalar_prefetch = 0 : i64, scratch_operands = 1 : i64, tpu.core_type = #tpu.core_type<tc>, window_params = [{transform_indices = @transform_0, window_bounds = array<i64: 16, 32>}, {transform_indices = @transform_1, window_bounds = array<i64: 32, 64>}, {transform_indices = @transform_2, window_bounds = array<i64: 1, 64>}, {transform_indices = @transform_3, window_bounds = array<i64: 16, 64>}]} {
    %c0_i32 = arith.constant 0 : i32
    %0 = arith.cmpi eq, %arg2, %c0_i32 : i32
    %1 = arith.extui %0 : i1 to i32
    %c0_i32_0 = arith.constant 0 : i32
    %2 = arith.cmpi ne, %1, %c0_i32_0 : i32
    scf.if %2 {
      %cst_10 = arith.constant 0.000000e+00 : f32
      %12 = vector.broadcast %cst_10 : f32 to vector<16x64xf32>
      %c0_11 = arith.constant 0 : index
      %c0_12 = arith.constant 0 : index
      %13 = vector.load %arg7[%c0_11, %c0_12] : memref<16x64xf32, #tpu.memory_space<vmem>>, vector<16x64xf32>
      tpu.vector_store %arg7[%c0_11, %c0_12], %12 {strides = array<i32>} : memref<16x64xf32, #tpu.memory_space<vmem>>, vector<16x64xf32>,
    } else {
    }
    %c0 = arith.constant 0 : index
    %c0_1 = arith.constant 0 : index
    %3 = vector.load %arg7[%c0, %c0_1] : memref<16x64xf32, #tpu.memory_space<vmem>>, vector<16x64xf32>
    %c0_2 = arith.constant 0 : index
    %c0_3 = arith.constant 0 : index
    %4 = vector.load %arg3[%c0_2, %c0_3] : memref<16x32xbf16, #tpu.memory_space<vmem>>, vector<16x32xbf16>
    %c0_4 = arith.constant 0 : index
    %c0_5 = arith.constant 0 : index
    %5 = vector.load %arg4[%c0_4, %c0_5] : memref<32x64xbf16, #tpu.memory_space<vmem>>, vector<32x64xbf16>
    %cst = arith.constant dense<0.000000e+00> : vector<16x64xf32>
    %6 = tpu.matmul %4, %5, %cst {dimension_numbers = #tpu.dot_dimension_numbers<[1], [0], [0], [1], [0, 0, 1, 1], [], []>} : vector<16x32xbf16>, vector<32x64xbf16>, vector<16x64xf32> -> vector<16x64xf32>
    %7 = arith.addf %3, %6 : vector<16x64xf32>
    %c0_6 = arith.constant 0 : index
    %c0_7 = arith.constant 0 : index
    %8 = vector.load %arg7[%c0_6, %c0_7] : memref<16x64xf32, #tpu.memory_space<vmem>>, vector<16x64xf32>
    tpu.vector_store %arg7[%c0_6, %c0_7], %7 {strides = array<i32>} : memref<16x64xf32, #tpu.memory_space<vmem>>, vector<16x64xf32>,
    %c0_i32_8 = arith.constant 0 : i32
    %9 = arith.cmpi eq, %arg2, %c0_i32_8 : i32
    %10 = arith.extui %9 : i1 to i32
    %c0_i32_9 = arith.constant 0 : i32
    %11 = arith.cmpi ne, %10, %c0_i32_9 : i32
    scf.if %11 {
      %c0_10 = arith.constant 0 : index
      %c0_11 = arith.constant 0 : index
      %12 = vector.load %arg7[%c0_10, %c0_11] : memref<16x64xf32, #tpu.memory_space<vmem>>, vector<16x64xf32>
      %c0_12 = arith.constant 0 : index
      %c0_13 = arith.constant 0 : index
      %13 = vector.load %arg5[%c0_12, %c0_13] : memref<1x64xf32, #tpu.memory_space<vmem>>, vector<1x64xf32>
      %14 = vector.broadcast %13 : vector<1x64xf32> to vector<16x64xf32>
      %15 = arith.addf %12, %14 : vector<16x64xf32>
      %16 = arith.truncf %15 : vector<16x64xf32> to vector<16x64xbf16>
      %c0_14 = arith.constant 0 : index
      %c0_15 = arith.constant 0 : index
      %17 = vector.load %arg6[%c0_14, %c0_15] : memref<16x64xbf16, #tpu.memory_space<vmem>>, vector<16x64xbf16>
      tpu.vector_store %arg6[%c0_14, %c0_15], %16 {strides = array<i32>} : memref<16x64xbf16, #tpu.memory_space<vmem>>, vector<16x64xbf16>,
    } else {
    }
    return
  }
  func.func @transform_0(%arg0: i32, %arg1: i32, %arg2: i32) -> (i32, i32) {
    %c0_i32 = arith.constant 0 : i32
    return %arg0, %arg2 : i32, i32
  }
  func.func @transform_1(%arg0: i32, %arg1: i32, %arg2: i32) -> (i32, i32) {
    %c0_i32 = arith.constant 0 : i32
    return %arg2, %arg1 : i32, i32
  }
  func.func @transform_2(%arg0: i32, %arg1: i32, %arg2: i32) -> (i32, i32) {
    %c0_i32 = arith.constant 0 : i32
    %c0_i32_0 = arith.constant 0 : i32
    return %c0_i32, %arg1 : i32, i32
  }
  func.func @transform_3(%arg0: i32, %arg1: i32, %arg2: i32) -> (i32, i32) {
    %c0_i32 = arith.constant 0 : i32
    return %arg0, %arg1 : i32, i32
  }
}

module attributes {stable_mosaic.version = 11 : i64} {
  func.func @_ffn_addln_kernel(%arg0: i32, %arg1: memref<16x32xbf16, #tpu.memory_space<vmem>>, %arg2: memref<32x64xbf16, #tpu.memory_space<vmem>>, %arg3: memref<1x64xf32, #tpu.memory_space<vmem>>, %arg4: memref<64x32xbf16, #tpu.memory_space<vmem>>, %arg5: memref<1x32xf32, #tpu.memory_space<vmem>>, %arg6: memref<1x32xf32, #tpu.memory_space<vmem>>, %arg7: memref<1x32xf32, #tpu.memory_space<vmem>>, %arg8: memref<16x32xbf16, #tpu.memory_space<vmem>>) attributes {dimension_semantics = [#tpu.dimension_semantics<parallel>], iteration_bounds = array<i64: 1>, scalar_prefetch = 0 : i64, scratch_operands = 0 : i64, tpu.core_type = #tpu.core_type<tc>, window_params = [{transform_indices = @transform_0, window_bounds = array<i64: 16, 32>}, {pipeline_mode = #tpu.pipeline_mode<synchronous>, transform_indices = @transform_1, window_bounds = array<i64: 32, 64>}, {pipeline_mode = #tpu.pipeline_mode<synchronous>, transform_indices = @transform_2, window_bounds = array<i64: 1, 64>}, {pipeline_mode = #tpu.pipeline_mode<synchronous>, transform_indices = @transform_3, window_bounds = array<i64: 64, 32>}, {pipeline_mode = #tpu.pipeline_mode<synchronous>, transform_indices = @transform_4, window_bounds = array<i64: 1, 32>}, {pipeline_mode = #tpu.pipeline_mode<synchronous>, transform_indices = @transform_5, window_bounds = array<i64: 1, 32>}, {pipeline_mode = #tpu.pipeline_mode<synchronous>, transform_indices = @transform_6, window_bounds = array<i64: 1, 32>}, {transform_indices = @transform_7, window_bounds = array<i64: 16, 32>}]} {
    %c0 = arith.constant 0 : index
    %c0_0 = arith.constant 0 : index
    %0 = vector.load %arg1[%c0, %c0_0] : memref<16x32xbf16, #tpu.memory_space<vmem>>, vector<16x32xbf16>
    %c0_1 = arith.constant 0 : index
    %c0_2 = arith.constant 0 : index
    %1 = vector.load %arg2[%c0_1, %c0_2] : memref<32x64xbf16, #tpu.memory_space<vmem>>, vector<32x64xbf16>
    %cst = arith.constant dense<0.000000e+00> : vector<16x64xf32>
    %2 = tpu.matmul %0, %1, %cst {dimension_numbers = #tpu.dot_dimension_numbers<[1], [0], [0], [1], [0, 0, 1, 1], [], []>} : vector<16x32xbf16>, vector<32x64xbf16>, vector<16x64xf32> -> vector<16x64xf32>
    %c0_3 = arith.constant 0 : index
    %c0_4 = arith.constant 0 : index
    %3 = vector.load %arg3[%c0_3, %c0_4] : memref<1x64xf32, #tpu.memory_space<vmem>>, vector<1x64xf32>
    %4 = vector.broadcast %3 : vector<1x64xf32> to vector<16x64xf32>
    %5 = arith.addf %2, %4 : vector<16x64xf32>
    %cst_5 = arith.constant 0.000000e+00 : f32
    %6 = vector.broadcast %cst_5 : f32 to vector<16x64xf32>
    %7 = arith.maximumf %5, %6 : vector<16x64xf32>
    %8 = arith.truncf %7 : vector<16x64xf32> to vector<16x64xbf16>
    %c0_6 = arith.constant 0 : index
    %c0_7 = arith.constant 0 : index
    %9 = vector.load %arg4[%c0_6, %c0_7] : memref<64x32xbf16, #tpu.memory_space<vmem>>, vector<64x32xbf16>
    %cst_8 = arith.constant dense<0.000000e+00> : vector<16x32xf32>
    %10 = tpu.matmul %8, %9, %cst_8 {dimension_numbers = #tpu.dot_dimension_numbers<[1], [0], [0], [1], [0, 0, 1, 1], [], []>} : vector<16x64xbf16>, vector<64x32xbf16>, vector<16x32xf32> -> vector<16x32xf32>
    %c0_9 = arith.constant 0 : index
    %c0_10 = arith.constant 0 : index
    %11 = vector.load %arg5[%c0_9, %c0_10] : memref<1x32xf32, #tpu.memory_space<vmem>>, vector<1x32xf32>
    %12 = vector.broadcast %11 : vector<1x32xf32> to vector<16x32xf32>
    %13 = arith.addf %10, %12 : vector<16x32xf32>
    %14 = arith.extf %0 : vector<16x32xbf16> to vector<16x32xf32>
    %15 = arith.addf %13, %14 : vector<16x32xf32>
    %cst_11 = arith.constant dense<0.000000e+00> : vector<16xf32>
    %16 = vector.multi_reduction <add>, %15, %cst_11 [1] : vector<16x32xf32> to vector<16xf32>
    %17 = vector.shape_cast %16 : vector<16xf32> to vector<16x1xf32>
    %cst_12 = arith.constant 3.200000e+01 : f32
    %18 = vector.broadcast %cst_12 : f32 to vector<16x1xf32>
    %19 = arith.divf %17, %18 : vector<16x1xf32>
    %20 = vector.broadcast %19 : vector<16x1xf32> to vector<16x32xf32>
    %21 = arith.subf %15, %20 : vector<16x32xf32>
    %22 = arith.mulf %21, %21 : vector<16x32xf32>
    %cst_13 = arith.constant dense<0.000000e+00> : vector<16xf32>
    %23 = vector.multi_reduction <add>, %22, %cst_13 [1] : vector<16x32xf32> to vector<16xf32>
    %24 = vector.shape_cast %23 : vector<16xf32> to vector<16x1xf32>
    %cst_14 = arith.constant 3.200000e+01 : f32
    %25 = vector.broadcast %cst_14 : f32 to vector<16x1xf32>
    %26 = arith.divf %24, %25 : vector<16x1xf32>
    %27 = vector.broadcast %19 : vector<16x1xf32> to vector<16x32xf32>
    %28 = arith.subf %15, %27 : vector<16x32xf32>
    %cst_15 = arith.constant 9.99999996E-13 : f32
    %29 = vector.broadcast %cst_15 : f32 to vector<16x1xf32>
    %30 = arith.addf %26, %29 : vector<16x1xf32>
    %31 = math.rsqrt %30 : vector<16x1xf32>
    %32 = vector.broadcast %31 : vector<16x1xf32> to vector<16x32xf32>
    %33 = arith.mulf %28, %32 : vector<16x32xf32>
    %c0_16 = arith.constant 0 : index
    %c0_17 = arith.constant 0 : index
    %34 = vector.load %arg6[%c0_16, %c0_17] : memref<1x32xf32, #tpu.memory_space<vmem>>, vector<1x32xf32>
    %35 = vector.broadcast %34 : vector<1x32xf32> to vector<16x32xf32>
    %36 = arith.mulf %33, %35 : vector<16x32xf32>
    %c0_18 = arith.constant 0 : index
    %c0_19 = arith.constant 0 : index
    %37 = vector.load %arg7[%c0_18, %c0_19] : memref<1x32xf32, #tpu.memory_space<vmem>>, vector<1x32xf32>
    %38 = vector.broadcast %37 : vector<1x32xf32> to vector<16x32xf32>
    %39 = arith.addf %36, %38 : vector<16x32xf32>
    %40 = arith.truncf %39 : vector<16x32xf32> to vector<16x32xbf16>
    %c0_20 = arith.constant 0 : index
    %c0_21 = arith.constant 0 : index
    %41 = vector.load %arg8[%c0_20, %c0_21] : memref<16x32xbf16, #tpu.memory_space<vmem>>, vector<16x32xbf16>
    tpu.vector_store %arg8[%c0_20, %c0_21], %40 {strides = array<i32>} : memref<16x32xbf16, #tpu.memory_space<vmem>>, vector<16x32xbf16>,
    return
  }
  func.func @transform_0(%arg0: i32) -> (i32, i32) {
    %c0_i32 = arith.constant 0 : i32
    %c0_i32_0 = arith.constant 0 : i32
    return %arg0, %c0_i32 : i32, i32
  }
  func.func @transform_1(%arg0: i32) -> (i32, i32) {
    %c0_i32 = arith.constant 0 : i32
    %c0_i32_0 = arith.constant 0 : i32
    %c0_i32_1 = arith.constant 0 : i32
    return %c0_i32, %c0_i32_0 : i32, i32
  }
  func.func @transform_2(%arg0: i32) -> (i32, i32) {
    %c0_i32 = arith.constant 0 : i32
    %c0_i32_0 = arith.constant 0 : i32
    %c0_i32_1 = arith.constant 0 : i32
    return %c0_i32, %c0_i32_0 : i32, i32
  }
  func.func @transform_3(%arg0: i32) -> (i32, i32) {
    %c0_i32 = arith.constant 0 : i32
    %c0_i32_0 = arith.constant 0 : i32
    %c0_i32_1 = arith.constant 0 : i32
    return %c0_i32, %c0_i32_0 : i32, i32
  }
  func.func @transform_4(%arg0: i32) -> (i32, i32) {
    %c0_i32 = arith.constant 0 : i32
    %c0_i32_0 = arith.constant 0 : i32
    %c0_i32_1 = arith.constant 0 : i32
    return %c0_i32, %c0_i32_0 : i32, i32
  }
  func.func @transform_5(%arg0: i32) -> (i32, i32) {
    %c0_i32 = arith.constant 0 : i32
    %c0_i32_0 = arith.constant 0 : i32
    %c0_i32_1 = arith.constant 0 : i32
    return %c0_i32, %c0_i32_0 : i32, i32
  }
  func.func @transform_6(%arg0: i32) -> (i32, i32) {
    %c0_i32 = arith.constant 0 : i32
    %c0_i32_0 = arith.constant 0 : i32
    %c0_i32_1 = arith.constant 0 : i32
    return %c0_i32, %c0_i32_0 : i32, i32
  }
  func.func @transform_7(%arg0: i32) -> (i32, i32) {
    %c0_i32 = arith.constant 0 : i32
    %c0_i32_0 = arith.constant 0 : i32
    return %arg0, %c0_i32 : i32, i32
  }
}

module attributes {stable_mosaic.version = 11 : i64} {
  func.func @_linear_kernel(%arg0: i32, %arg1: i32, %arg2: i32, %arg3: memref<16x32xbf16, #tpu.memory_space<vmem>>, %arg4: memref<32x128xbf16, #tpu.memory_space<vmem>>, %arg5: memref<1x128xf32, #tpu.memory_space<vmem>>, %arg6: memref<16x50xf32, #tpu.memory_space<vmem>>, %arg7: memref<16x128xf32, #tpu.memory_space<vmem>>) attributes {dimension_semantics = [#tpu.dimension_semantics<parallel>, #tpu.dimension_semantics<parallel>, #tpu.dimension_semantics<arbitrary>], iteration_bounds = array<i64: 1, 1, 1>, scalar_prefetch = 0 : i64, scratch_operands = 1 : i64, tpu.core_type = #tpu.core_type<tc>, window_params = [{transform_indices = @transform_0, window_bounds = array<i64: 16, 32>}, {transform_indices = @transform_1, window_bounds = array<i64: 32, 128>}, {transform_indices = @transform_2, window_bounds = array<i64: 1, 128>}, {transform_indices = @transform_3, window_bounds = array<i64: 16, 50>}]} {
    %c0_i32 = arith.constant 0 : i32
    %0 = arith.cmpi eq, %arg2, %c0_i32 : i32
    %1 = arith.extui %0 : i1 to i32
    %c0_i32_0 = arith.constant 0 : i32
    %2 = arith.cmpi ne, %1, %c0_i32_0 : i32
    scf.if %2 {
      %cst_10 = arith.constant 0.000000e+00 : f32
      %12 = vector.broadcast %cst_10 : f32 to vector<16x128xf32>
      %c0_11 = arith.constant 0 : index
      %c0_12 = arith.constant 0 : index
      %13 = vector.load %arg7[%c0_11, %c0_12] : memref<16x128xf32, #tpu.memory_space<vmem>>, vector<16x128xf32>
      tpu.vector_store %arg7[%c0_11, %c0_12], %12 {strides = array<i32>} : memref<16x128xf32, #tpu.memory_space<vmem>>, vector<16x128xf32>,
    } else {
    }
    %c0 = arith.constant 0 : index
    %c0_1 = arith.constant 0 : index
    %3 = vector.load %arg7[%c0, %c0_1] : memref<16x128xf32, #tpu.memory_space<vmem>>, vector<16x128xf32>
    %c0_2 = arith.constant 0 : index
    %c0_3 = arith.constant 0 : index
    %4 = vector.load %arg3[%c0_2, %c0_3] : memref<16x32xbf16, #tpu.memory_space<vmem>>, vector<16x32xbf16>
    %c0_4 = arith.constant 0 : index
    %c0_5 = arith.constant 0 : index
    %5 = vector.load %arg4[%c0_4, %c0_5] : memref<32x128xbf16, #tpu.memory_space<vmem>>, vector<32x128xbf16>
    %cst = arith.constant dense<0.000000e+00> : vector<16x128xf32>
    %6 = tpu.matmul %4, %5, %cst {dimension_numbers = #tpu.dot_dimension_numbers<[1], [0], [0], [1], [0, 0, 1, 1], [], []>} : vector<16x32xbf16>, vector<32x128xbf16>, vector<16x128xf32> -> vector<16x128xf32>
    %7 = arith.addf %3, %6 : vector<16x128xf32>
    %c0_6 = arith.constant 0 : index
    %c0_7 = arith.constant 0 : index
    %8 = vector.load %arg7[%c0_6, %c0_7] : memref<16x128xf32, #tpu.memory_space<vmem>>, vector<16x128xf32>
    tpu.vector_store %arg7[%c0_6, %c0_7], %7 {strides = array<i32>} : memref<16x128xf32, #tpu.memory_space<vmem>>, vector<16x128xf32>,
    %c0_i32_8 = arith.constant 0 : i32
    %9 = arith.cmpi eq, %arg2, %c0_i32_8 : i32
    %10 = arith.extui %9 : i1 to i32
    %c0_i32_9 = arith.constant 0 : i32
    %11 = arith.cmpi ne, %10, %c0_i32_9 : i32
    scf.if %11 {
      %c0_10 = arith.constant 0 : index
      %c0_11 = arith.constant 0 : index
      %12 = vector.load %arg7[%c0_10, %c0_11] : memref<16x128xf32, #tpu.memory_space<vmem>>, vector<16x128xf32>
      %c0_12 = arith.constant 0 : index
      %c0_13 = arith.constant 0 : index
      %13 = vector.load %arg5[%c0_12, %c0_13] : memref<1x128xf32, #tpu.memory_space<vmem>>, vector<1x128xf32>
      %14 = vector.broadcast %13 : vector<1x128xf32> to vector<16x128xf32>
      %15 = arith.addf %12, %14 : vector<16x128xf32>
      %16 = vector.extract_strided_slice %15 {offsets = [0, 0], sizes = [16, 50], strides = [1, 1]} : vector<16x128xf32> to vector<16x50xf32>
      %c0_14 = arith.constant 0 : index
      %c0_15 = arith.constant 0 : index
      %17 = vector.load %arg6[%c0_14, %c0_15] : memref<16x50xf32, #tpu.memory_space<vmem>>, vector<16x50xf32>
      tpu.vector_store %arg6[%c0_14, %c0_15], %16 {strides = array<i32>} : memref<16x50xf32, #tpu.memory_space<vmem>>, vector<16x50xf32>,
    } else {
    }
    return
  }
  func.func @transform_0(%arg0: i32, %arg1: i32, %arg2: i32) -> (i32, i32) {
    %c0_i32 = arith.constant 0 : i32
    return %arg0, %arg2 : i32, i32
  }
  func.func @transform_1(%arg0: i32, %arg1: i32, %arg2: i32) -> (i32, i32) {
    %c0_i32 = arith.constant 0 : i32
    return %arg2, %arg1 : i32, i32
  }
  func.func @transform_2(%arg0: i32, %arg1: i32, %arg2: i32) -> (i32, i32) {
    %c0_i32 = arith.constant 0 : i32
    %c0_i32_0 = arith.constant 0 : i32
    return %c0_i32, %arg1 : i32, i32
  }
  func.func @transform_3(%arg0: i32, %arg1: i32, %arg2: i32) -> (i32, i32) {
    %c0_i32 = arith.constant 0 : i32
    return %arg0, %arg1 : i32, i32
  }
}

</mosaic_0001>

<bundles_post_ra>
// kernel: custom_decoder_forward.17
= control target key start
LH: loop header
LB: loop body
LE: loop exit
PB: predicated region body
PF: predicated region fallthrough
CT: control target
= control target key end

     0   :  { %vm19_vm0 = vcmask 785408   ;;  %v151_v0 = vmov 0.0   ;;  %vm152_vm1 = vmmov 0   ;;  %vm47_vm2 = vcmask 261120   ;;  %s195_s1 = inlined_call_operand.vmem [shape: bf16[32,96], index: 1, kind: input, shape index: {}]   ;;  %s196_s0 = inlined_call_operand.vmem [shape: bf16[16,32], index: 0, kind: input, shape index: {}]   ;;  %s197_s2 = inlined_call_operand.vmem [shape: f32[1,96], index: 2, kind: input, shape index: {}]   ;;  %s198_s3 = inlined_call_operand.vmem [shape: bf16[16,96], index: 3, kind: output, shape index: {}]  }
   0x1   :  { %138 = vmatprep.subr.bf16.mxu0 %v151_v0  ;;  %v148_v1 = vld [vmem:[%s195_s1 + $0x8] sm:$0xff]   ;;  %142 = vmatprep.mubr.msk.bf16.mxu0 %vm152_vm1, %v151_v0  ;;  %20 = vst.msk [vmem:[#allocation2] sm:$0xff] %vm19_vm0, %v151_v0  ;;  %21 = vst.msk [vmem:[#allocation2 + $0x8] sm:$0xff] %vm19_vm0, %v151_v0  ;;  %v149_v2 = vld [vmem:[%s195_s1] sm:$0xff]   ;;  %vm119_vm3 = vcmask 781312  }
   0x2   :  { %139 = vmatpush3.bf16.msra.mxu0 %v148_v1  ;;  %v150_v3 = vld [vmem:[%s196_s0] sm:$0xff]  }
   0x3   :  { %140 = vmatprep.subr.bf16.mxu0 %v151_v0  ;;  %v130_v12 = vld [vmem:[%s197_s2] ss:$0 sm:$0xff] }
   0x6   :  { %141 = vmatpush3.bf16.msra.mxu0 %v149_v2 }
   0x8   :  { %v22_v4 = vld [vmem:[#allocation2] sm:$0xff]  ;;  %v23_v8 = vld [vmem:[#allocation2 + $0x8] sm:$0xff] }
   0x9   :  { %143 = vmatmul.mubr.msk.bf16.vlgmr.msra.gmra.mxu0 %vm47_vm2, %v150_v3 }
  0xc9   :  { %v85_v5 = vpop.f32.mrf.mxu0 }
  0xca   :  { %v92_v6 = vadd.f32 %v85_v5, %v22_v4 }
  0xcb   :  { %v144_v7 = vpop.f32.mrf.mxu0 }
  0xcc   :  { %95 = vst.msk [vmem:[#allocation2] sm:$0xff] %vm19_vm0, %v92_v6 }
  0xcd   :  { %v88_v9 = vpop.f32.mrf.mxu0 }
  0xce   :  { %v93_v10 = vadd.f32 %v88_v9, %v23_v8 }
  0xcf   :  { %v145_v11 = vpop.f32.mrf.mxu0 }
  0xd0   :  { %96 = vst.msk [vmem:[#allocation2 + $0x8] sm:$0xff] %vm19_vm0, %v93_v10 }
  0xd3   :  { %v100_v13 = vld [vmem:[#allocation2] sm:$0xff] }
  0xd4   :  { %v109_v14 = vadd.f32 %v130_v12, %v100_v13 }
  0xd6   :  { %v133_v15 = vpack.c.bf16 %v109_v14, %v109_v14 }
  0xd7   :  { %v101_v16 = vld [vmem:[#allocation2 + $0x8] sm:$0xff] }
  0xd8   :  { %120 = vst.msk [vmem:[%s198_s3] sm:$0xf] %vm119_vm3, %v133_v15  ;;  %v110_v17 = vadd.f32 %v130_v12, %v101_v16 }
  0xda   :  { %v134_v18 = vpack.c.bf16 %v110_v17, %v110_v17 }
  0xdc   :  { %121 = vst.msk [vmem:[%s198_s3 + $0x4] sm:$0xf] %vm119_vm3, %v134_v18 }

// kernel: custom_decoder_forward.20
= control target key start
LH: loop header
LB: loop body
LE: loop exit
PB: predicated region body
PF: predicated region fallthrough
CT: control target
= control target key end

     0   :  { %vm19_vm0 = vcmask 261120   ;;  %v150_v0 = vmov 0.0   ;;  %vm151_vm1 = vmmov 0   ;;  %vm118_vm2 = vcmask 257024   ;;  %s195_s1 = inlined_call_operand.vmem [shape: bf16[32,32], index: 1, kind: input, shape index: {}]   ;;  %s196_s0 = inlined_call_operand.vmem [shape: bf16[16,32], index: 0, kind: input, shape index: {}]   ;;  %s197_s2 = inlined_call_operand.vmem [shape: f32[1,32], index: 2, kind: input, shape index: {}]   ;;  %s198_s3 = inlined_call_operand.vmem [shape: bf16[16,32], index: 3, kind: output, shape index: {}]  }
   0x1   :  { %137 = vmatprep.subr.bf16.mxu0 %v150_v0  ;;  %v147_v1 = vld [vmem:[%s195_s1 + $0x8] sm:$0xff]   ;;  %141 = vmatprep.mubr.msk.bf16.mxu0 %vm151_vm1, %v150_v0  ;;  %20 = vst.msk [vmem:[#allocation2] sm:$0xff] %vm19_vm0, %v150_v0  ;;  %21 = vst.msk [vmem:[#allocation2 + $0x8] sm:$0xff] %vm19_vm0, %v150_v0  ;;  %v148_v2 = vld [vmem:[%s195_s1] sm:$0xff]  }
   0x2   :  { %138 = vmatpush3.bf16.msra.mxu0 %v147_v1  ;;  %v149_v3 = vld [vmem:[%s196_s0] sm:$0xff]  }
   0x3   :  { %139 = vmatprep.subr.bf16.mxu0 %v150_v0  ;;  %v129_v12 = vld [vmem:[%s197_s2] ss:$0 sm:$0xff] }
   0x6   :  { %140 = vmatpush3.bf16.msra.mxu0 %v148_v2 }
   0x8   :  { %v22_v4 = vld [vmem:[#allocation2] sm:$0xff]  ;;  %v23_v8 = vld [vmem:[#allocation2 + $0x8] sm:$0xff] }
   0x9   :  { %142 = vmatmul.mubr.msk.bf16.vlgmr.msra.gmra.mxu0 %vm19_vm0, %v149_v3 }
  0xc9   :  { %v85_v5 = vpop.f32.mrf.mxu0 }
  0xca   :  { %v92_v6 = vadd.f32 %v85_v5, %v22_v4 }
  0xcb   :  { %v143_v7 = vpop.f32.mrf.mxu0 }
  0xcc   :  { %94 = vst.msk [vmem:[#allocation2] sm:$0xff] %vm19_vm0, %v92_v6 }
  0xcd   :  { %v88_v9 = vpop.f32.mrf.mxu0 }
  0xce   :  { %v93_v10 = vadd.f32 %v88_v9, %v23_v8 }
  0xcf   :  { %v144_v11 = vpop.f32.mrf.mxu0 }
  0xd0   :  { %95 = vst.msk [vmem:[#allocation2 + $0x8] sm:$0xff] %vm19_vm0, %v93_v10 }
  0xd3   :  { %v99_v13 = vld [vmem:[#allocation2] sm:$0xff] }
  0xd4   :  { %v108_v14 = vadd.f32 %v129_v12, %v99_v13 }
  0xd6   :  { %v132_v15 = vpack.c.bf16 %v108_v14, %v108_v14 }
  0xd7   :  { %v100_v16 = vld [vmem:[#allocation2 + $0x8] sm:$0xff] }
  0xd8   :  { %119 = vst.msk [vmem:[%s198_s3] sm:$0xf] %vm118_vm2, %v132_v15  ;;  %v109_v17 = vadd.f32 %v129_v12, %v100_v16 }
  0xda   :  { %v133_v18 = vpack.c.bf16 %v109_v17, %v109_v17 }
  0xdc   :  { %120 = vst.msk [vmem:[%s198_s3 + $0x4] sm:$0xf] %vm118_vm2, %v133_v18 }

// kernel: custom_decoder_forward.19
= control target key start
LH: loop header
LB: loop body
LE: loop exit
PB: predicated region body
PF: predicated region fallthrough
CT: control target
= control target key end

     0   :  { %vm28_vm0 = vcmask 261120   ;;  %v220_v0 = vmov 0.0   ;;  %vm221_vm1 = vmmov 0   ;;  %vm178_vm2 = vcmask 257024   ;;  %s293_s1 = inlined_call_operand.vmem [shape: bf16[32,32], index: 1, kind: input, shape index: {}]   ;;  %s294_s0 = inlined_call_operand.vmem [shape: bf16[16,32], index: 0, kind: input, shape index: {}]   ;;  %s295_s3 = inlined_call_operand.vmem [shape: bf16[16,32], index: 3, kind: input, shape index: {}]   ;;  %s296_s2 = inlined_call_operand.vmem [shape: f32[1,32], index: 2, kind: input, shape index: {}]   ;;  %s297_s4 = inlined_call_operand.vmem [shape: f32[1,32], index: 4, kind: input, shape index: {}]   ;;  %s298_s5 = inlined_call_operand.vmem [shape: f32[1,32], index: 5, kind: input, shape index: {}]   ;;  %s299_s6 = inlined_call_operand.vmem [shape: bf16[16,32], index: 6, kind: output, shape index: {}]  }
   0x1   :  { %203 = vmatprep.subr.bf16.mxu0 %v220_v0  ;;  %v213_v1 = vld [vmem:[%s293_s1 + $0x8] sm:$0xff]   ;;  %207 = vmatprep.mubr.msk.bf16.mxu0 %vm221_vm1, %v220_v0  ;;  %29 = vst.msk [vmem:[#allocation2] sm:$0xff] %vm28_vm0, %v220_v0  ;;  %30 = vst.msk [vmem:[#allocation2 + $0x8] sm:$0xff] %vm28_vm0, %v220_v0  ;;  %v214_v2 = vld [vmem:[%s293_s1] sm:$0xff]  }
   0x2   :  { %204 = vmatpush3.bf16.msra.mxu0 %v213_v1  ;;  %v215_v3 = vld [vmem:[%s294_s0] sm:$0xff]  }
   0x3   :  { %205 = vmatprep.subr.bf16.mxu0 %v220_v0  ;;  %v197_v12 = vld [vmem:[%s295_s3] sm:$0xff]  }
   0x4   :  { %v189_v13 = vld [vmem:[%s296_s2] ss:$0 sm:$0xff]  ;;  %v198_v14 = vunpack.c.l.bf16 %v197_v12  ;;  %v199_v18 = vunpack.c.h.bf16 %v197_v12 }
   0x5   :  { %v190_v41 = vld [vmem:[%s297_s4] ss:$0 sm:$0xff] }
   0x6   :  { %206 = vmatpush3.bf16.msra.mxu0 %v214_v2  ;;  %v191_v43 = vld [vmem:[%s298_s5] ss:$0 sm:$0xff] }
   0x8   :  { %v31_v4 = vld [vmem:[#allocation2] sm:$0xff]  ;;  %v32_v8 = vld [vmem:[#allocation2 + $0x8] sm:$0xff] }
   0x9   :  { %208 = vmatmul.mubr.msk.bf16.vlgmr.msra.gmra.mxu0 %vm28_vm0, %v215_v3 }
  0xc9   :  { %v94_v5 = vpop.f32.mrf.mxu0 }
  0xca   :  { %v101_v6 = vadd.f32 %v94_v5, %v31_v4 }
  0xcb   :  { %v209_v7 = vpop.f32.mrf.mxu0 }
  0xcc   :  { %103 = vst.msk [vmem:[#allocation2] sm:$0xff] %vm28_vm0, %v101_v6 }
  0xcd   :  { %v97_v9 = vpop.f32.mrf.mxu0 }
  0xce   :  { %v102_v10 = vadd.f32 %v97_v9, %v32_v8 }
  0xcf   :  { %v210_v11 = vpop.f32.mrf.mxu0 }
  0xd0   :  { %104 = vst.msk [vmem:[#allocation2 + $0x8] sm:$0xff] %vm28_vm0, %v102_v10 }
  0xd3   :  { %v108_v15 = vld [vmem:[#allocation2] sm:$0xff] }
  0xd4   :  { %v117_v16 = vadd.f32 %v189_v13, %v108_v15 }
  0xd6   :  { %v123_v17 = vadd.f32 %v198_v14, %v117_v16 }
  0xd7   :  { %v109_v19 = vld [vmem:[#allocation2 + $0x8] sm:$0xff] }
  0xd8   :  { %v125_v20 = vsel %vm28_vm0, %v123_v17, 0.0  ;;  %v118_v21 = vadd.f32 %v189_v13, %v109_v19 }
  0xd9   :  { %126 = vadd.xlane.f32.xlu0 %v125_v20 }
  0xda   :  { %v124_v22 = vadd.f32 %v199_v18, %v118_v21 }
  0xdc   :  { %v128_v23 = vsel %vm28_vm0, %v124_v22, 0.0 }
  0xdd   :  { %129 = vadd.xlane.f32.xlu0 %v128_v23 }
 0x162   :  { %v127_v24 = vpop.xlane.xlu0 %126 }
 0x163   :  { %v132_v25 = vmul.f32 0.03125, %v127_v24 }
 0x165   :  { %v134_v26 = vsub.f32 %v123_v17, %v132_v25 }
 0x166   :  { %v130_v27 = vpop.xlane.xlu0 %129 }
 0x167   :  { %v133_v28 = vmul.f32 0.03125, %v130_v27  ;;  %v136_v29 = vmul.f32 %v134_v26, %v134_v26 }
 0x169   :  { %v135_v30 = vsub.f32 %v124_v22, %v133_v28  ;;  %v138_v31 = vsel %vm28_vm0, %v136_v29, 0.0 }
 0x16a   :  { %139 = vadd.xlane.f32.xlu1 %v138_v31 }
 0x16b   :  { %v137_v32 = vmul.f32 %v135_v30, %v135_v30 }
 0x16d   :  { %v141_v33 = vsel %vm28_vm0, %v137_v32, 0.0 }
 0x16e   :  { %142 = vadd.xlane.f32.xlu1 %v141_v33 }
 0x1f3   :  { %v140_v34 = vpop.xlane.xlu1 %139 }
 0x1f4   :  { %v144_v35 = vmul.f32 0.03125, %v140_v34 }
 0x1f6   :  { %v146_v36 = vadd.f32 1e-12, %v144_v35 }
 0x1f7   :  { %v143_v37 = vpop.xlane.xlu1 %142 }
 0x1f8   :  { %216 = vrsqrt.f32 %v146_v36  ;;  %v145_v38 = vmul.f32 0.03125, %v143_v37 }
 0x1fa   :  { %v147_v39 = vadd.f32 1e-12, %v145_v38 }
 0x1fc   :  { %218 = vrsqrt.f32 %v147_v39 }
 0x205   :  { %v217_v40 = vpop.eup %216 }
 0x206   :  { %v150_v42 = vmul.f32 %v217_v40, %v134_v26 }
 0x208   :  { %v159_v44 = vmul.f32 %v190_v41, %v150_v42 }
 0x209   :  { %v219_v45 = vpop.eup %218 }
 0x20a   :  { %v168_v46 = vadd.f32 %v191_v43, %v159_v44  ;;  %v151_v47 = vmul.f32 %v219_v45, %v135_v30 }
 0x20c   :  { %v194_v48 = vpack.c.bf16 %v168_v46, %v168_v46  ;;  %v160_v49 = vmul.f32 %v190_v41, %v151_v47 }
 0x20e   :  { %179 = vst.msk [vmem:[%s299_s6] sm:$0xf] %vm178_vm2, %v194_v48  ;;  %v169_v50 = vadd.f32 %v191_v43, %v160_v49 }
 0x210   :  { %v195_v51 = vpack.c.bf16 %v169_v50, %v169_v50 }
 0x212   :  { %180 = vst.msk [vmem:[%s299_s6 + $0x4] sm:$0xf] %vm178_vm2, %v195_v51 }

// kernel: custom_decoder_forward.18
= control target key start
LH: loop header
LB: loop body
LE: loop exit
PB: predicated region body
PF: predicated region fallthrough
CT: control target
= control target key end

     0   :  { %s1089_s15 = smov 0   ;;  %s1091_s16 = smov 0   ;;  %s1216_s0 = inlined_call_operand.vmem [shape: bf16[2,8,32], index: 0, kind: input, shape index: {}]   ;;  %s1217_s1 = inlined_call_operand.vmem [shape: bf16[2,8,32], index: 1, kind: input, shape index: {}]   ;;  %s1218_s2 = inlined_call_operand.vmem [shape: bf16[2,8,32], index: 2, kind: input, shape index: {}]   ;;  %s1219_s3 = inlined_call_operand.vmem [shape: f32[2,8,8], index: 3, kind: input, shape index: {}]   ;;  %s1220_s4 = inlined_call_operand.vmem [shape: bf16[2,8,32], index: 4, kind: output, shape index: {}]  }
   0x1   :  { %s1093_s17 = smov 0  }
   0x2 LB: > { %s26_s18 = sadd.s32 1, %s1050_s16  ;;  %p892_p0 = scmp.ge.s32.totalorder %s1054_s17, 1  ;;  %s1054_s17 = sphi %s1093_s17, %s14_s17   ;;  %s1050_s16 = sphi %s1091_s16, %s1222_s16   ;;  %s1046_s15 = sphi %s1089_s15, %s1221_s15  }
   0x3   : > { %p28_p1 = scmp.ge.s32.totalorder %s26_s18, 2  ;;  %p212_p2 = scmp.lt.s32.totalorder %s1054_s17, 3 }
   0x5   : > { %s1224_s18 = smov (%p28_p1, %s26_s18), 0  ;;  %p213_p3 = pnand %p892_p0, %p212_p2 }
   0x6   : > { %p257_p4 = scmp.lt.s32.totalorder (!%p213_p3), %s1046_s15, 1  ;;  %s1058_s30 = smov (!%p213_p3), 120  }
   0x7   : > { %216 = sbr.rel (%p213_p3) target bundleno = 1416 (0x588), region = 36  ;;  %s1059_s5 = smov (!%p213_p3), 112  }
   0x8   : > { %s1060_s6 = smov (!%p213_p3), 104   ;;  %s1061_s13 = smov (!%p213_p3), 8  }
   0x9   : > { %s1062_s14 = smov (!%p213_p3), 16  }
   0xc   : > { %v1056_v0 = vmov 0.0   ;;  %vm1057_vm0 = vmmov 0   ;;  %s1226_s15 = smov (!%p257_p4, %s1046_s15), 1  ;;  %vm292_vm1 = vcmask 64512   ;;  %vm356_vm3 = vcmask 1043456  }
   0xd   : > { %933 = vmatprep.subr.bf16.mxu0 %v1056_v0  ;;  %935 = vmatprep.mubr.msk.bf16.mxu0 %vm1057_vm0, %v1056_v0  ;;  %s1113_s19 = sshll.u32 %s1226_s15, 2  ;;  %s896_s26 = sshll.u32 %s1226_s15, 3  ;;  %vm401_vm4 = vcmask 60416   ;;  %vm531_vm5 = vcmask 126016   ;;  %vm652_vm6 = vcmask 191616   ;;  %vm773_vm7 = vcmask 257216  }
   0xe   : > { %939 = vmatprep.subr.bf16.mxu1 %v1056_v0  ;;  %941 = vmatprep.mubr.msk.bf16.mxu1 %vm1057_vm0, %v1056_v0  ;;  %s267_s22 = scalar_lea.vmem %s1217_s1, %s1113_s19  ;;  %s263_s25 = scalar_lea.vmem %s1216_s0, %s1113_s19 }
   0xf   : > { %v288_v1 = vld [vmem:[%s267_s22] sm:$0xf]  ;;  %s278_s29 = scalar_lea.vmem %s1219_s3, %s896_s26  ;;  %s271_s9 = scalar_lea.vmem %s1218_s2, %s1113_s19 }
  0x10   : > { %v297_v2 = vsel %vm292_vm1, %v288_v1, 0  ;;  %v287_v3 = vld [vmem:[%s263_s25] sm:$0xf]  ;;  %v901_v12 = vcombine.low %v288_v1, %v288_v1  ;;  %s1172_s12 = scalar_lea.vmem %s1220_s4, %s1113_s19  ;;  %s1063_s15 = smov 24  }
  0x11   : > { %934 = vmatpush3.bf16.xpose.msra.mxu0 %v297_v2  ;;  %v1131_v4 = vld [vmem:[%s278_s29] sm:$0xff]  ;;  %v900_v13 = vcombine.low %v287_v3, %v287_v3 }
  0x12   : > { %951 = vmatprep.subr.bf16.mxu0 %v1056_v0  ;;  %vm291_vm2 = vcmp.gt.f32.partialorder %v1131_v4, 0.0  ;;  %411 = vrot.lane.b32.xlu1 %v901_v12, %s1058_s30  ;;  %v1147_v19 = vld [vmem:[%s271_s9] sm:$0xf] }
  0x13   : > { %v358_v20 = vsel %vm356_vm3, %v1147_v19, 0 }
  0x14   : > { %940 = vmatpush3.bf16.msra.mxu1 %v358_v20 }
  0x15   : > { %945 = vmatprep.subr.bf16.mxu1 %v1056_v0 }
  0x16   : > { %406 = vrot.lane.b32.xlu1 %v900_v13, %s1058_s30 }
  0x18   : > { %936 = vmatmul.mubr.msk.bf16.vlgmr.msra.gmra.mxu0 %vm292_vm1, %v287_v3 }
  0x19   : > { %953 = vmatprep.mubr.msk.bf16.mxu0 %vm1057_vm0, %v1056_v0 }
  0x1a   : > { %533 = vrot.lane.b32.xlu1 %v900_v13, %s1059_s5 }
  0x1e   : > { %656 = vrot.lane.b32.xlu1 %v901_v12, %s1060_s6 }
  0x22   : > { %654 = vrot.lane.b32.xlu1 %v900_v13, %s1060_s6 }
  0x84   : > { %v412_v23 = vpop.permute.xlu1 %411 }
  0x85   : > { %v417_v25 = vsel %vm292_vm1, %v412_v23, 0 }
  0x88   : > { %v407_v27 = vpop.permute.xlu1 %406 }
  0x8c   : > { %v534_v29 = vpop.permute.xlu1 %533 }
  0x90   : > { %v657_v31 = vpop.permute.xlu1 %656 }
  0x91   : > { %v662_v32 = vsel %vm292_vm1, %v657_v31, 0 }
  0x94   : > { %v655_v33 = vpop.permute.xlu1 %654 }
  0xd8   : > { %v333_v5 = vpop.f32.mrf.mxu0 }
  0xd9   : > { %v339_v6 = vmul.f32 0.35355338, %v333_v5 }
  0xda   : > { %v937_v7 = vpop.f32.mrf.mxu0 }
  0xdb   : > { %v340_v8 = vsel %vm291_vm2, %v339_v6, -1e+09  ;;  %v903_v7 = vcombine.low %v1147_v19, %v1147_v19 }
  0xdc   : > { %v336_v9 = vpop.f32.mrf.mxu0  ;;  %v341_v10 = vsel %vm292_vm1, %v340_v8, -inf }
  0xdd   : > { %342 = vmax.xlane.f32.xlu0 %v341_v10 }
  0xde   : > { %v938_v11 = vpop.f32.mrf.mxu0 }
 0x166   : > { %v343_v14 = vpop.xlane.xlu0 %342 }
 0x167   : > { %v344_v15 = vsub.f32 %v340_v8, %v343_v14 }
 0x169   : > { %v345_v16 = vmul.f32 1.442695, %v344_v15 }
 0x16b   : > { %1016 = vpow2.f32 %v345_v16 }
 0x178   : > { %v1017_v17 = vpop.eup %1016 }
 0x179   : > { %v347_v18 = vsel %vm292_vm1, %v1017_v17, 0.0 }
 0x17a   : > { %348 = vadd.xlane.f32.xlu0 %v347_v18 }
 0x190   : > { %535 = vrot.lane.b32.xlu0 %v901_v12, %s1059_s5 }
 0x203   : > { %v349_v21 = vpop.xlane.xlu0 %348 }
 0x204   : > { %1018 = vrcp.f32 %v349_v21 }
 0x207   : > { %v536_v28 = vpop.permute.xlu0 %535 }
 0x208   : > { %v541_v30 = vsel %vm292_vm1, %v536_v28, 0 }
 0x211   : > { %v1019_v22 = vpop.eup %1018 }
 0x212   : > { %v351_v24 = vmul.f32 %v1019_v22, %v1017_v17 }
 0x214   : > { %v352_v26 = vpack.c.bf16 %v351_v24, %v351_v24 }
 0x216   : > { %942 = vmatmul.mubr.msk.bf16.vlgmr.msra.gmra.mxu1 %vm292_vm1, %v352_v26 }
 0x217   : > { %946 = vmatpush3.bf16.xpose.msra.mxu1 %v417_v25  ;;  %947 = vmatprep.mubr.msk.bf16.mxu1 %vm1057_vm0, %v1056_v0 }
 0x218   : > { %957 = vmatprep.subr.bf16.mxu1 %v1056_v0 }
 0x21e   : > { %948 = vmatmul.mubr.msk.bf16.vlgmr.msra.gmra.mxu1 %vm292_vm1, %v407_v27 }
 0x21f   : > { %958 = vmatpush3.bf16.xpose.msra.mxu1 %v541_v30  ;;  %959 = vmatprep.mubr.msk.bf16.mxu1 %vm1057_vm0, %v1056_v0 }
 0x220   : > { %969 = vmatprep.subr.bf16.mxu1 %v1056_v0 }
 0x226   : > { %960 = vmatmul.mubr.msk.bf16.vlgmr.msra.gmra.mxu1 %vm292_vm1, %v534_v29 }
 0x227   : > { %970 = vmatpush3.bf16.xpose.msra.mxu1 %v662_v32  ;;  %971 = vmatprep.mubr.msk.bf16.mxu1 %vm1057_vm0, %v1056_v0 }
 0x22e   : > { %972 = vmatmul.mubr.msk.bf16.vlgmr.msra.gmra.mxu1 %vm292_vm1, %v655_v33 }
 0x2d6   : > { %v394_v34 = vpop.f32.mrf.mxu1 }
 0x2d7   : > { %v400_v35 = vpack.c.bf16 %v394_v34, %v394_v34 }
 0x2d8   : > { %v943_v36 = vpop.f32.mrf.mxu1 }
 0x2d9   : > { %402 = vst.msk [vmem:[%s1172_s12] sm:$0xf] %vm401_vm4, %v400_v35 }
 0x2da   : > { %v397_v37 = vpop.f32.mrf.mxu1 }
 0x2dc   : > { %v944_v38 = vpop.f32.mrf.mxu1 }
 0x2de   : > { %v453_v39 = vpop.f32.mrf.mxu1 }
 0x2df   : > { %v459_v40 = vmul.f32 0.35355338, %v453_v39 }
 0x2e0   : > { %v949_v41 = vpop.f32.mrf.mxu1 }
 0x2e1   : > { %v460_v42 = vsel %vm291_vm2, %v459_v40, -1e+09 }
 0x2e2   : > { %v456_v43 = vpop.f32.mrf.mxu1  ;;  %v461_v44 = vsel %vm292_vm1, %v460_v42, -inf }
 0x2e3   : > { %462 = vmax.xlane.f32.xlu1 %v461_v44 }
 0x2e4   : > { %v950_v45 = vpop.f32.mrf.mxu1 }
 0x2e6   : > { %v577_v46 = vpop.f32.mrf.mxu1 }
 0x2e7   : > { %v583_v47 = vmul.f32 0.35355338, %v577_v46 }
 0x2e8   : > { %v961_v48 = vpop.f32.mrf.mxu1 }
 0x2e9   : > { %v584_v49 = vsel %vm291_vm2, %v583_v47, -1e+09 }
 0x2ea   : > { %v580_v50 = vpop.f32.mrf.mxu1  ;;  %v585_v51 = vsel %vm292_vm1, %v584_v49, -inf }
 0x2eb   : > { %586 = vmax.xlane.f32.xlu0 %v585_v51 }
 0x2ec   : > { %v962_v52 = vpop.f32.mrf.mxu1 }
 0x2ee   : > { %v698_v53 = vpop.f32.mrf.mxu1 }
 0x2ef   : > { %v704_v54 = vmul.f32 0.35355338, %v698_v53 }
 0x2f0   : > { %v973_v55 = vpop.f32.mrf.mxu1 }
 0x2f1   : > { %v705_v56 = vsel %vm291_vm2, %v704_v54, -1e+09 }
 0x2f2   : > { %v706_v57 = vsel %vm292_vm1, %v705_v56, -inf  ;;  %v701_v58 = vpop.f32.mrf.mxu1 }
 0x2f3   : > { %707 = vmax.xlane.f32.xlu1 %v706_v57 }
 0x2f4   : > { %v974_v59 = vpop.f32.mrf.mxu1 }
 0x36c   : > { %v463_v60 = vpop.xlane.xlu1 %462 }
 0x36d   : > { %v464_v61 = vsub.f32 %v460_v42, %v463_v60 }
 0x36f   : > { %v465_v62 = vmul.f32 1.442695, %v464_v61 }
 0x371   : > { %1020 = vpow2.f32 %v465_v62 }
 0x374   : > { %v587_v63 = vpop.xlane.xlu0 %586 }
 0x375   : > { %v588_v1 = vsub.f32 %v584_v49, %v587_v63 }
 0x377   : > { %v589_v2 = vmul.f32 1.442695, %v588_v1 }
 0x379   : > { %1022 = vpow2.f32 %v589_v2 }
 0x37c   : > { %v708_v8 = vpop.xlane.xlu1 %707 }
 0x37d   : > { %v709_v9 = vsub.f32 %v705_v56, %v708_v8 }
 0x37e   : > { %v1021_v3 = vpop.eup %1020 }
 0x37f   : > { %v467_v5 = vsel %vm292_vm1, %v1021_v3, 0.0  ;;  %v710_v10 = vmul.f32 1.442695, %v709_v9 }
 0x380   : > { %468 = vadd.xlane.f32.xlu1 %v467_v5 }
 0x381   : > { %1024 = vpow2.f32 %v710_v10 }
 0x386   : > { %v1023_v6 = vpop.eup %1022 }
 0x387   : > { %v591_v4 = vsel %vm292_vm1, %v1023_v6, 0.0 }
 0x388   : > { %592 = vadd.xlane.f32.xlu0 %v591_v4 }
 0x38e   : > { %v1025_v11 = vpop.eup %1024 }
 0x38f   : > { %v712_v12 = vsel %vm292_vm1, %v1025_v11, 0.0 }
 0x391   : > { %597 = vrot.lane.b32.xlu1 %v903_v7, %s1059_s5 }
 0x39e   : > { %476 = vrot.lane.b32.xlu0 %v903_v7, %s1058_s30 }
 0x3b5   : > { %713 = vadd.xlane.f32.xlu1 %v712_v12 }
 0x3c6   : > { %718 = vrot.lane.b32.xlu1 %v903_v7, %s1060_s6 }
 0x409   : > { %v469_v13 = vpop.xlane.xlu1 %468 }
 0x40a   : > { %1026 = vrcp.f32 %v469_v13 }
 0x40d   : > { %v598_v19 = vpop.permute.xlu1 %597 }
 0x40e   : > { %v603_v21 = vsel %vm356_vm3, %v598_v19, 0 }
 0x411   : > { %v593_v14 = vpop.xlane.xlu0 %592 }
 0x412   : > { %1028 = vrcp.f32 %v593_v14 }
 0x415   : > { %v477_v15 = vpop.permute.xlu0 %476 }
 0x416   : > { %v482_v16 = vsel %vm356_vm3, %v477_v15, 0 }
 0x417   : > { %v1027_v17 = vpop.eup %1026  ;;  %952 = vmatpush3.bf16.msra.mxu0 %v482_v16 }
 0x418   : > { %963 = vmatprep.subr.bf16.mxu0 %v1056_v0  ;;  %v471_v18 = vmul.f32 %v1027_v17, %v1021_v3 }
 0x41a   : > { %v472_v20 = vpack.c.bf16 %v471_v18, %v471_v18 }
 0x41c   : > { %954 = vmatmul.mubr.msk.bf16.vlgmr.msra.gmra.mxu0 %vm292_vm1, %v472_v20 }
 0x41d   : > { %964 = vmatpush3.bf16.msra.mxu0 %v603_v21  ;;  %965 = vmatprep.mubr.msk.bf16.mxu0 %vm1057_vm0, %v1056_v0 }
 0x41e   : > { %975 = vmatprep.subr.bf16.mxu0 %v1056_v0 }
 0x41f   : > { %v1029_v22 = vpop.eup %1028 }
 0x420   : > { %v595_v23 = vmul.f32 %v1029_v22, %v1023_v6 }
 0x422   : > { %v596_v24 = vpack.c.bf16 %v595_v23, %v595_v23 }
 0x424   : > { %966 = vmatmul.mubr.msk.bf16.vlgmr.msra.gmra.mxu0 %vm292_vm1, %v596_v24 }
 0x425   : > { %977 = vmatprep.mubr.msk.bf16.mxu0 %vm1057_vm0, %v1056_v0 }
 0x43e   : > { %v714_v25 = vpop.xlane.xlu1 %713 }
 0x43f   : > { %1030 = vrcp.f32 %v714_v25 }
 0x442   : > { %v719_v26 = vpop.permute.xlu1 %718 }
 0x443   : > { %v724_v27 = vsel %vm356_vm3, %v719_v26, 0 }
 0x444   : > { %976 = vmatpush3.bf16.msra.mxu0 %v724_v27 }
 0x44c   : > { %v1031_v28 = vpop.eup %1030 }
 0x44d   : > { %v716_v29 = vmul.f32 %v1031_v28, %v1025_v11 }
 0x44f   : > { %v717_v30 = vpack.c.bf16 %v716_v29, %v716_v29 }
 0x451   : > { %978 = vmatmul.mubr.msk.bf16.vlgmr.msra.gmra.mxu0 %vm292_vm1, %v717_v30 }
 0x4dc   : > { %v518_v31 = vpop.f32.mrf.mxu0 }
 0x4dd   : > { %v914_v32 = vpack.c.bf16 %v518_v31, %v518_v31 }
 0x4de   : > { %v955_v33 = vpop.f32.mrf.mxu0 }
 0x4df   : > { %528 = vrot.lane.b32.xlu0 %v914_v32, %s1061_s13 }
 0x4e0   : > { %v521_v34 = vpop.f32.mrf.mxu0 }
 0x4e2   : > { %v956_v35 = vpop.f32.mrf.mxu0 }
 0x4e4   : > { %v639_v36 = vpop.f32.mrf.mxu0 }
 0x4e5   : > { %v915_v0 = vpack.c.bf16 %v639_v36, %v639_v36 }
 0x4e6   : > { %v967_v37 = vpop.f32.mrf.mxu0 }
 0x4e7   : > { %649 = vrot.lane.b32.xlu1 %v915_v0, %s1062_s14 }
 0x4e8   : > { %v642_v38 = vpop.f32.mrf.mxu0 }
 0x4ea   : > { %v968_v39 = vpop.f32.mrf.mxu0 }
 0x511   : > { %v760_v40 = vpop.f32.mrf.mxu0 }
 0x512   : > { %v916_v41 = vpack.c.bf16 %v760_v40, %v760_v40 }
 0x513   : > { %v979_v42 = vpop.f32.mrf.mxu0 }
 0x514   : > { %770 = vrot.lane.b32.xlu0 %v916_v41, %s1063_s15 }
 0x515   : > { %v763_v43 = vpop.f32.mrf.mxu0 }
 0x517   : > { %v980_v44 = vpop.f32.mrf.mxu0 }
 0x551   : > { %v529_v45 = vpop.permute.xlu0 %528 }
 0x552   : > { %532 = vst.msk [vmem:[%s1172_s12] sm:$0xf] %vm531_vm5, %v529_v45 }
 0x559   : > { %v650_v46 = vpop.permute.xlu1 %649 }
 0x55a   : > { %653 = vst.msk [vmem:[%s1172_s12] sm:$0xf] %vm652_vm6, %v650_v46 }
 0x586   : > { %v771_v47 = vpop.permute.xlu0 %770 }
 0x587   : > { %774 = vst.msk [vmem:[%s1172_s12] sm:$0xf] %vm773_vm7, %v771_v47 }
 0x588 PF: > { %s14_s17 = sadd.s32 1, %s1054_s17   ;;  %s1221_s15 = smov %s1050_s16 }
 0x589   : > { %p11_p5 = scmp.ge.s32.totalorder %s14_s17, 4   ;;  %s1222_s16 = smov %s1224_s18 }
 0x58b   :  { %13 = sbr.rel (!%p11_p5) target bundleno = 2 (0x2), region = 75 }

// kernel: custom_decoder_forward.21
= control target key start
LH: loop header
LB: loop body
LE: loop exit
PB: predicated region body
PF: predicated region fallthrough
CT: control target
= control target key end

     0   :  { %vm19_vm0 = vcmask 523264   ;;  %v151_v0 = vmov 0.0   ;;  %vm152_vm1 = vmmov 0   ;;  %vm47_vm2 = vcmask 261120   ;;  %s195_s1 = inlined_call_operand.vmem [shape: bf16[32,64], index: 1, kind: input, shape index: {}]   ;;  %s196_s0 = inlined_call_operand.vmem [shape: bf16[16,32], index: 0, kind: input, shape index: {}]   ;;  %s197_s2 = inlined_call_operand.vmem [shape: f32[1,64], index: 2, kind: input, shape index: {}]   ;;  %s198_s3 = inlined_call_operand.vmem [shape: bf16[16,64], index: 3, kind: output, shape index: {}]  }
   0x1   :  { %138 = vmatprep.subr.bf16.mxu0 %v151_v0  ;;  %v148_v1 = vld [vmem:[%s195_s1 + $0x8] sm:$0xff]   ;;  %142 = vmatprep.mubr.msk.bf16.mxu0 %vm152_vm1, %v151_v0  ;;  %20 = vst.msk [vmem:[#allocation2] sm:$0xff] %vm19_vm0, %v151_v0  ;;  %21 = vst.msk [vmem:[#allocation2 + $0x8] sm:$0xff] %vm19_vm0, %v151_v0  ;;  %v149_v2 = vld [vmem:[%s195_s1] sm:$0xff]   ;;  %vm119_vm3 = vcmask 519168  }
   0x2   :  { %139 = vmatpush3.bf16.msra.mxu0 %v148_v1  ;;  %v150_v3 = vld [vmem:[%s196_s0] sm:$0xff]  }
   0x3   :  { %140 = vmatprep.subr.bf16.mxu0 %v151_v0  ;;  %v130_v12 = vld [vmem:[%s197_s2] ss:$0 sm:$0xff] }
   0x6   :  { %141 = vmatpush3.bf16.msra.mxu0 %v149_v2 }
   0x8   :  { %v22_v4 = vld [vmem:[#allocation2] sm:$0xff]  ;;  %v23_v8 = vld [vmem:[#allocation2 + $0x8] sm:$0xff] }
   0x9   :  { %143 = vmatmul.mubr.msk.bf16.vlgmr.msra.gmra.mxu0 %vm47_vm2, %v150_v3 }
  0xc9   :  { %v85_v5 = vpop.f32.mrf.mxu0 }
  0xca   :  { %v92_v6 = vadd.f32 %v85_v5, %v22_v4 }
  0xcb   :  { %v144_v7 = vpop.f32.mrf.mxu0 }
  0xcc   :  { %95 = vst.msk [vmem:[#allocation2] sm:$0xff] %vm19_vm0, %v92_v6 }
  0xcd   :  { %v88_v9 = vpop.f32.mrf.mxu0 }
  0xce   :  { %v93_v10 = vadd.f32 %v88_v9, %v23_v8 }
  0xcf   :  { %v145_v11 = vpop.f32.mrf.mxu0 }
  0xd0   :  { %96 = vst.msk [vmem:[#allocation2 + $0x8] sm:$0xff] %vm19_vm0, %v93_v10 }
  0xd3   :  { %v100_v13 = vld [vmem:[#allocation2] sm:$0xff] }
  0xd4   :  { %v109_v14 = vadd.f32 %v130_v12, %v100_v13 }
  0xd6   :  { %v133_v15 = vpack.c.bf16 %v109_v14, %v109_v14 }
  0xd7   :  { %v101_v16 = vld [vmem:[#allocation2 + $0x8] sm:$0xff] }
  0xd8   :  { %120 = vst.msk [vmem:[%s198_s3] sm:$0xf] %vm119_vm3, %v133_v15  ;;  %v110_v17 = vadd.f32 %v130_v12, %v101_v16 }
  0xda   :  { %v134_v18 = vpack.c.bf16 %v110_v17, %v110_v17 }
  0xdc   :  { %121 = vst.msk [vmem:[%s198_s3 + $0x4] sm:$0xf] %vm119_vm3, %v134_v18 }

// kernel: custom_decoder_forward.33
= control target key start
LH: loop header
LB: loop body
LE: loop exit
PB: predicated region body
PF: predicated region fallthrough
CT: control target
= control target key end

     0   :  { %v175_v1 = vmov 0.0   ;;  %vm176_vm0 = vmmov 0   ;;  %s215_s0 = inlined_call_operand.vmem [shape: bf16[16,32], index: 0, kind: input, shape index: {}]   ;;  %s216_s1 = inlined_call_operand.vmem [shape: bf16[32,128], index: 1, kind: input, shape index: {}]   ;;  %s217_s2 = inlined_call_operand.vmem [shape: f32[1,128], index: 2, kind: input, shape index: {}]   ;;  %s218_s3 = inlined_call_operand.hbm [shape: f32[16,50], index: 3, kind: output, shape index: {}]  }
   0x1   :  { %v150_v0 = vld [vmem:[%s216_s1 + $0x8] sm:$0xff]   ;;  %137 = vmatprep.subr.bf16.mxu0 %v175_v1  ;;  %v151_v2 = vld [vmem:[%s216_s1] sm:$0xff]   ;;  %141 = vmatprep.mubr.msk.bf16.mxu0 %vm176_vm0, %v175_v1 }
   0x2   :  { %138 = vmatpush3.bf16.msra.mxu0 %v150_v0 }
   0x3   :  { %139 = vmatprep.subr.bf16.mxu0 %v175_v1 }
   0x4   :  { %8 = vsyncpa [#allocation4], 0  ;;  %v152_v3 = vld [vmem:[%s215_s0] sm:$0xff]   ;;  %vm47_vm1 = vcmask 261120   ;;  %vm110_vm2 = vcmask 408576   ;;  %s177_s20 = smov [#allocation3]  }
   0x5   :  { %v133_v4 = vld [vmem:[%s217_s2] ss:$0 sm:$0xff]  ;;  %s118_s1 = sshll.u32 %s177_s20, 4  ;;  %s119_s1 = int_to_ptr.vmem [resolvable:$true] %s118_s1 }
   0x6   :  { %140 = vmatpush3.bf16.msra.mxu0 %v151_v2  ;;  %s153_s0 = scalar_lea.vmem %s119_s1, 256  ;;  %p158_p1 = scmp.lt.s32.totalorder %s119_s1, %s119_s1 }
   0x7   :  { %p154_p0 = scmp.ne.s32.totalorder %s119_s1, %s153_s0  ;;  %p159_p2 = scmp.lt.s32.totalorder %s153_s0, %s153_s0 }
   0x9   :  { %142 = vmatmul.mubr.msk.bf16.vlgmr.msra.gmra.mxu0 %vm47_vm1, %v152_v3  ;;  %p160_p3 = por %p159_p2, %p158_p1 }
   0xb   :  { %p161_p4 = pnand %p160_p3, %p154_p0 }
  0xc9   :  { %v85_v5 = vpop.f32.mrf.mxu0 }
  0xca   :  { %v108_v6 = vadd.f32 %v133_v4, %v85_v5 }
  0xcb   :  { %v143_v7 = vpop.f32.mrf.mxu0 }
  0xcc   :  { %111 = vst.msk [vmem:[#allocation3] sm:$0xff] %vm110_vm2, %v108_v6 }
  0xcd   :  { %v88_v8 = vpop.f32.mrf.mxu0 }
  0xce   :  { %v109_v9 = vadd.f32 %v133_v4, %v88_v8 }
  0xcf   :  { %v144_v10 = vpop.f32.mrf.mxu0 }
  0xd0   :  { %112 = vst.msk [vmem:[#allocation3 + $0x8] sm:$0xff] %vm110_vm2, %v109_v9 }
  0xd1   :  { %164 = shalt.err (!%p161_p4)
}
  0xd2   :  { %s178_s2 = smov 128   ;;  %s179_s21 = smov 8  }
  0xd3   :  { %124 = dma.vmem_to_hbm [thread:$0]  %s119_s1, 256, %s218_s3, [#allocation4], %s178_s2, %s178_s2, %s179_s21  }
  0xd4   :  { %173 = dma.done.wait [#allocation4], 256  }
  0xd5   :  { %174 = vsyncadd [#allocation4], 4294967040 }
  0xd6   :  { %128 = vsyncpa [#allocation4], 1 }

// kernel: custom_decoder_forward.24
= control target key start
LH: loop header
LB: loop body
LE: loop exit
PB: predicated region body
PF: predicated region fallthrough
CT: control target
= control target key end

     0   :  { %v312_v0 = vmov 0.0   ;;  %vm313_vm0 = vmmov 0   ;;  %vm57_vm1 = vcmask 261120   ;;  %vm144_vm2 = vcmask 523264   ;;  %s398_s1 = inlined_call_operand.vmem [shape: bf16[32,64], index: 1, kind: input, shape index: {}]   ;;  %s399_s0 = inlined_call_operand.vmem [shape: bf16[16,32], index: 0, kind: input, shape index: {}]   ;;  %s400_s3 = inlined_call_operand.vmem [shape: bf16[64,32], index: 3, kind: input, shape index: {}]   ;;  %s401_s2 = inlined_call_operand.vmem [shape: f32[1,64], index: 2, kind: input, shape index: {}]   ;;  %s402_s4 = inlined_call_operand.vmem [shape: f32[1,32], index: 4, kind: input, shape index: {}]   ;;  %s403_s5 = inlined_call_operand.vmem [shape: f32[1,32], index: 5, kind: input, shape index: {}]   ;;  %s404_s6 = inlined_call_operand.vmem [shape: f32[1,32], index: 6, kind: input, shape index: {}]   ;;  %s405_s7 = inlined_call_operand.vmem [shape: bf16[16,32], index: 7, kind: output, shape index: {}]  }
   0x1   :  { %278 = vmatprep.subr.bf16.mxu0 %v312_v0  ;;  %v300_v1 = vld [vmem:[%s398_s1 + $0x8] sm:$0xff]   ;;  %282 = vmatprep.mubr.msk.bf16.mxu0 %vm313_vm0, %v312_v0  ;;  %v301_v2 = vld [vmem:[%s398_s1] sm:$0xff]   ;;  %v303_v4 = vld [vmem:[%s400_s3 + $0x18] sm:$0xff]   ;;  %vm246_vm3 = vcmask 257024  }
   0x2   :  { %286 = vmatprep.subr.bf16.mxu1 %v312_v0  ;;  %294 = vmatprep.mubr.msk.bf16.mxu1 %vm313_vm0, %v312_v0  ;;  %v27_v3 = vld [vmem:[%s399_s0] sm:$0xff]   ;;  %v304_v5 = vld [vmem:[%s400_s3 + $0x10] sm:$0xff]   ;;  %v305_v6 = vld [vmem:[%s400_s3 + $0x8] sm:$0xff]  }
   0x3   :  { %279 = vmatpush3.bf16.msra.mxu0 %v300_v1  ;;  %287 = vmatpush3.bf16.msra.mxu1 %v303_v4  ;;  %v306_v7 = vld [vmem:[%s400_s3] sm:$0xff]   ;;  %v189_v19 = vunpack.c.l.bf16 %v27_v3  ;;  %v190_v24 = vunpack.c.h.bf16 %v27_v3 }
   0x4   :  { %280 = vmatprep.subr.bf16.mxu0 %v312_v0  ;;  %288 = vmatprep.subr.bf16.mxu1 %v312_v0  ;;  %v253_v8 = vld [vmem:[%s401_s2] ss:$0 sm:$0xff] }
   0x5   :  { %v258_v18 = vld [vmem:[%s402_s4] ss:$0 sm:$0xff] }
   0x6   :  { %v264_v48 = vld [vmem:[%s403_s5] ss:$0 sm:$0xff] }
   0x7   :  { %281 = vmatpush3.bf16.msra.mxu0 %v301_v2  ;;  %289 = vmatpush3.bf16.msra.mxu1 %v304_v5  ;;  %v265_v50 = vld [vmem:[%s404_s6] ss:$0 sm:$0xff] }
   0x8   :  { %290 = vmatprep.subr.bf16.mxu1 %v312_v0 }
   0xa   :  { %283 = vmatmul.mubr.msk.bf16.vlgmr.msra.gmra.mxu0 %vm57_vm1, %v27_v3 }
   0xb   :  { %291 = vmatpush3.bf16.msra.mxu1 %v305_v6 }
   0xc   :  { %292 = vmatprep.subr.bf16.mxu1 %v312_v0 }
   0xf   :  { %293 = vmatpush3.bf16.msra.mxu1 %v306_v7 }
  0xca   :  { %v95_v9 = vpop.f32.mrf.mxu0 }
  0xcb   :  { %v96_v11 = vadd.f32 %v253_v8, %v95_v9 }
  0xcc   :  { %v284_v10 = vpop.f32.mrf.mxu0 }
  0xcd   :  { %v102_v15 = vmax.f32 %v96_v11, 0.0 }
  0xce   :  { %v98_v12 = vpop.f32.mrf.mxu0 }
  0xcf   :  { %v99_v13 = vadd.f32 %v253_v8, %v98_v12 }
  0xd0   :  { %v285_v14 = vpop.f32.mrf.mxu0 }
  0xd1   :  { %v103_v16 = vmax.f32 %v99_v13, 0.0 }
  0xd3   :  { %v104_v17 = vpack.c.bf16 %v103_v16, %v102_v15 }
  0xd5   :  { %295 = vmatmul.mubr.msk.bf16.vlgmr.msra.gmra.mxu1 %vm144_vm2, %v104_v17 }
 0x195   :  { %v182_v20 = vpop.f32.mrf.mxu1 }
 0x196   :  { %v183_v21 = vadd.f32 %v258_v18, %v182_v20 }
 0x197   :  { %v296_v22 = vpop.f32.mrf.mxu1 }
 0x198   :  { %v191_v23 = vadd.f32 %v189_v19, %v183_v21 }
 0x199   :  { %v185_v25 = vpop.f32.mrf.mxu1 }
 0x19a   :  { %v186_v26 = vadd.f32 %v258_v18, %v185_v25  ;;  %v193_v27 = vsel %vm57_vm1, %v191_v23, 0.0 }
 0x19b   :  { %194 = vadd.xlane.f32.xlu0 %v193_v27  ;;  %v297_v28 = vpop.f32.mrf.mxu1 }
 0x19c   :  { %v192_v29 = vadd.f32 %v190_v24, %v186_v26 }
 0x19e   :  { %v196_v30 = vsel %vm57_vm1, %v192_v29, 0.0 }
 0x19f   :  { %197 = vadd.xlane.f32.xlu0 %v196_v30 }
 0x224   :  { %v195_v31 = vpop.xlane.xlu0 %194 }
 0x225   :  { %v200_v32 = vmul.f32 0.03125, %v195_v31 }
 0x227   :  { %v202_v33 = vsub.f32 %v191_v23, %v200_v32 }
 0x228   :  { %v198_v34 = vpop.xlane.xlu0 %197 }
 0x229   :  { %v201_v35 = vmul.f32 0.03125, %v198_v34  ;;  %v204_v36 = vmul.f32 %v202_v33, %v202_v33 }
 0x22b   :  { %v203_v37 = vsub.f32 %v192_v29, %v201_v35  ;;  %v206_v38 = vsel %vm57_vm1, %v204_v36, 0.0 }
 0x22c   :  { %207 = vadd.xlane.f32.xlu1 %v206_v38 }
 0x22d   :  { %v205_v39 = vmul.f32 %v203_v37, %v203_v37 }
 0x22f   :  { %v209_v40 = vsel %vm57_vm1, %v205_v39, 0.0 }
 0x230   :  { %210 = vadd.xlane.f32.xlu1 %v209_v40 }
 0x2b5   :  { %v208_v41 = vpop.xlane.xlu1 %207 }
 0x2b6   :  { %v212_v42 = vmul.f32 0.03125, %v208_v41 }
 0x2b8   :  { %v214_v43 = vadd.f32 1e-12, %v212_v42 }
 0x2b9   :  { %v211_v44 = vpop.xlane.xlu1 %210 }
 0x2ba   :  { %308 = vrsqrt.f32 %v214_v43  ;;  %v213_v45 = vmul.f32 0.03125, %v211_v44 }
 0x2bc   :  { %v215_v46 = vadd.f32 1e-12, %v213_v45 }
 0x2be   :  { %310 = vrsqrt.f32 %v215_v46 }
 0x2c7   :  { %v309_v47 = vpop.eup %308 }
 0x2c8   :  { %v218_v49 = vmul.f32 %v309_v47, %v202_v33 }
 0x2ca   :  { %v227_v51 = vmul.f32 %v264_v48, %v218_v49 }
 0x2cb   :  { %v311_v52 = vpop.eup %310 }
 0x2cc   :  { %v236_v53 = vadd.f32 %v265_v50, %v227_v51  ;;  %v219_v54 = vmul.f32 %v311_v52, %v203_v37 }
 0x2ce   :  { %v268_v55 = vpack.c.bf16 %v236_v53, %v236_v53  ;;  %v228_v56 = vmul.f32 %v264_v48, %v219_v54 }
 0x2d0   :  { %247 = vst.msk [vmem:[%s405_s7] sm:$0xf] %vm246_vm3, %v268_v55  ;;  %v237_v57 = vadd.f32 %v265_v50, %v228_v56 }
 0x2d2   :  { %v269_v58 = vpack.c.bf16 %v237_v57, %v237_v57 }
 0x2d4   :  { %248 = vst.msk [vmem:[%s405_s7 + $0x4] sm:$0xf] %vm246_vm3, %v269_v58 }

</bundles_post_ra>
